<compile_context>
chip_gen: v5e
topology: v5e:2x2
jax: 0.10.0
libtpu: 0.0.40
codegen_flags: <defaults>
</compile_context>

<pallas_src>
import functools

import jax
import jax.numpy as jnp
from jax.experimental import pallas as pl
from jax.experimental.pallas import tpu as pltpu

TM_MAX = 512      # max row tile (flattened N*Ho*Wo spatial positions)
LANES = 128       # pad output channels to a multiple of this (lane-dense stores)


def _round_up(x, m):
    return (x + m - 1) // m * m


# ---------------------------------------------------------------------------
# Pallas kernel: fused conv (im2col matmul) + bias + ReLU + BN-stat partials
# ---------------------------------------------------------------------------
def _conv_relu_stats_kernel(a_ref, w_ref, b_ref, y_ref, stats_ref, *, m_true, tm):
    # MXU matmul: bf16 operands, f32 accumulation.
    y = jnp.dot(a_ref[...], w_ref[...], preferred_element_type=jnp.float32)
    y = jnp.maximum(y + b_ref[...], 0.0)           # bias + ReLU, all f32
    y_ref[...] = y                                 # lane-dense full-width store

    # Per-tile BatchNorm partial statistics (sum and sum of squares); rows past
    # the true M (padded rows) are masked so they never pollute the statistics.
    row = pl.program_id(0) * tm + jax.lax.broadcasted_iota(jnp.int32, (tm, 1), 0)
    ym = jnp.where(row < m_true, y, 0.0)
    s1 = jnp.sum(ym, axis=0, keepdims=True)        # (1, Cpad)
    s2 = jnp.sum(ym * ym, axis=0, keepdims=True)   # (1, Cpad)
    # Assemble a full (8, Cpad) slab (sum in sublane 0, sumsq in sublane 1,
    # zeros elsewhere) so the stats store is one unmasked full-width vst.
    sub = jax.lax.broadcasted_iota(jnp.int32, (8, 1), 0)
    stats_ref[...] = jnp.where(sub == 0, s1, jnp.where(sub == 1, s2, 0.0))


def conv3x3_relu_with_stats(patches, w_mat, bias, m_true, *, tm):
    """patches: (m_pad, K) bf16, w_mat: (K, Cpad) bf16, bias: (1, Cpad) f32."""
    m_pad, k = patches.shape
    cpad = w_mat.shape[1]
    n_tiles = m_pad // tm
    kernel = functools.partial(_conv_relu_stats_kernel, m_true=m_true, tm=tm)
    return pl.pallas_call(
        kernel,
        out_shape=(jax.ShapeDtypeStruct((m_pad, cpad), jnp.float32),
                   jax.ShapeDtypeStruct((n_tiles * 8, cpad), jnp.float32)),
        grid=(n_tiles,),
        in_specs=[pl.BlockSpec((tm, k), lambda i: (i, 0)),
                  pl.BlockSpec((k, cpad), lambda i: (0, 0)),
                  pl.BlockSpec((1, cpad), lambda i: (0, 0))],
        out_specs=(pl.BlockSpec((tm, cpad), lambda i: (i, 0)),
                   pl.BlockSpec((8, cpad), lambda i: (i, 0))),
        compiler_params=pltpu.CompilerParams(
            dimension_semantics=("parallel",),      # no cross-tile carry anymore
            vmem_limit_bytes=32 * 1024 * 1024),
    )(patches, w_mat, bias)


# ---------------------------------------------------------------------------
# JAX glue: im2col (NHWC), BN parameter math, layout plumbing
# ---------------------------------------------------------------------------
def _im2col_3x3_nhwc(x_nhwc, padding):
    """(N, H, W, C) -> (N*Ho*Wo, C*9); column order (c, kh, kw) matches
    PyTorch's w.reshape(C_out, C_in*9)."""
    n, h, w, c = x_nhwc.shape
    xp = jnp.pad(x_nhwc, ((0, 0), (padding, padding), (padding, padding), (0, 0)))
    ho = h + 2 * padding - 2
    wo = w + 2 * padding - 2
    taps = []
    for kh in range(3):
        for kw in range(3):
            taps.append(xp[:, kh:kh + ho, kw:kw + wo, :])
    p = jnp.stack(taps, axis=-1)                   # (N, Ho, Wo, C, 9)
    return p.reshape(n * ho * wo, c * 9), ho, wo


def _conv_bn_stage(x_nhwc, w, b, gamma, beta, *, padding, batch_norm, eps):
    n = x_nhwc.shape[0]
    c_out = w.shape[0]

    # TODO(synk): for large channel counts switch to implicit in-kernel im2col
    # (halo DMA + 9 accumulating dots) to cut input HBM traffic ~9x; at these
    # toy sizes the materialized patch matrix is tiny so it stays explicit.
    patches, ho, wo = _im2col_3x3_nhwc(x_nhwc, padding)
    m = patches.shape[0]

    tm = min(TM_MAX, _round_up(m, 8))
    m_pad = _round_up(m, tm)
    patches = jnp.pad(patches, ((0, m_pad - m), (0, 0))).astype(jnp.bfloat16)

    cpad = _round_up(c_out, LANES)
    w_mat = jnp.pad(w.reshape(c_out, -1).T, ((0, 0), (0, cpad - c_out)))
    w_mat = w_mat.astype(jnp.bfloat16)                           # (K, Cpad)
    bias = jnp.pad(b, (0, cpad - c_out)).reshape(1, cpad).astype(jnp.float32)

    y, stats = conv3x3_relu_with_stats(patches, w_mat, bias, m, tm=tm)
    y = y[:m, :c_out]                                            # drop padding

    if batch_norm:
        s = stats.reshape(m_pad // tm, 8, cpad)[:, :2, :c_out]
        mean = jnp.sum(s[:, 0, :], axis=0) / m
        # Biased variance, as in PyTorch training-mode BatchNorm2d forward;
        # clamp guards against cancellation in E[x^2] - E[x]^2.
        var = jnp.maximum(jnp.sum(s[:, 1, :], axis=0) / m - mean * mean, 0.0)
        scale = gamma * jax.lax.rsqrt(var + eps)
        shift = beta - mean * scale
        # Plain-JAX affine: XLA fuses it with the neighbouring reshape / next
        # stage's im2col pad, so no extra HBM round trip for the activation.
        y = y * scale + shift

    return y.reshape(n, ho, wo, c_out)                           # stay NHWC


def unet_conv_block(x_nchw, params, *, padding=1, batch_norm=True, eps=1e-5):
    x = jnp.transpose(x_nchw, (0, 2, 3, 1))                      # NCHW -> NHWC once
    y = _conv_bn_stage(x, params["w1"], params["b1"],
                       params.get("gamma1"), params.get("beta1"),
                       padding=padding, batch_norm=batch_norm, eps=eps)
    y = _conv_bn_stage(y, params["w2"], params["b2"],
                       params.get("gamma2"), params.get("beta2"),
                       padding=padding, batch_norm=batch_norm, eps=eps)
    return jnp.transpose(y, (0, 3, 1, 2))                        # NHWC -> NCHW once


# ---------------------------------------------------------------------------
# Main
# ---------------------------------------------------------------------------
if __name__ == "__main__":
    key = jax.random.PRNGKey(0)
    k_x, k_w1, k_b1, k_w2, k_b2 = jax.random.split(key, 5)

    N, C_IN, H, W = 2, 4, 16, 16
    C_OUT = 8
    PADDING = True       # nn.Conv2d(..., padding=int(True)) -> padding=1
    BATCH_NORM = True

    x = jax.random.normal(k_x, (N, C_IN, H, W), dtype=jnp.float32)

    params = {
        "w1": 0.1 * jax.random.normal(k_w1, (C_OUT, C_IN, 3, 3), dtype=jnp.float32),
        "b1": 0.1 * jax.random.normal(k_b1, (C_OUT,), dtype=jnp.float32),
        "w2": 0.1 * jax.random.normal(k_w2, (C_OUT, C_OUT, 3, 3), dtype=jnp.float32),
        "b2": 0.1 * jax.random.normal(k_b2, (C_OUT,), dtype=jnp.float32),
        # PyTorch BatchNorm2d default init: weight=1, bias=0
        "gamma1": jnp.ones((C_OUT,), dtype=jnp.float32),
        "beta1": jnp.zeros((C_OUT,), dtype=jnp.float32),
        "gamma2": jnp.ones((C_OUT,), dtype=jnp.float32),
        "beta2": jnp.zeros((C_OUT,), dtype=jnp.float32),
    }

    fwd = jax.jit(functools.partial(unet_conv_block,
                                    padding=int(PADDING), batch_norm=BATCH_NORM))
    out = jax.block_until_ready(fwd(x, params))
    assert out.shape == (N, C_OUT, H, W), out.shape
    print("KERNEL_OK")
</pallas_src>

<mosaic_0001>
module attributes {stable_mosaic.version = 11 : i64} {
  func.func @_conv_relu_stats_kernel(%arg0: i32, %arg1: memref<512x36xbf16, #tpu.memory_space<vmem>>, %arg2: memref<36x128xbf16, #tpu.memory_space<vmem>>, %arg3: memref<1x128xf32, #tpu.memory_space<vmem>>, %arg4: memref<512x128xf32, #tpu.memory_space<vmem>>, %arg5: memref<8x128xf32, #tpu.memory_space<vmem>>) attributes {dimension_semantics = [#tpu.dimension_semantics<parallel>], iteration_bounds = array<i64: 1>, scalar_prefetch = 0 : i64, scratch_operands = 0 : i64, tpu.core_type = #tpu.core_type<tc>, window_params = [{transform_indices = @transform_0, window_bounds = array<i64: 512, 36>}, {pipeline_mode = #tpu.pipeline_mode<synchronous>, transform_indices = @transform_1, window_bounds = array<i64: 36, 128>}, {pipeline_mode = #tpu.pipeline_mode<synchronous>, transform_indices = @transform_2, window_bounds = array<i64: 1, 128>}, {transform_indices = @transform_3, window_bounds = array<i64: 512, 128>}, {transform_indices = @transform_4, window_bounds = array<i64: 8, 128>}]} {
    %c0 = arith.constant 0 : index
    %c0_0 = arith.constant 0 : index
    %0 = vector.load %arg1[%c0, %c0_0] : memref<512x36xbf16, #tpu.memory_space<vmem>>, vector<512x36xbf16>
    %c0_1 = arith.constant 0 : index
    %c0_2 = arith.constant 0 : index
    %1 = vector.load %arg2[%c0_1, %c0_2] : memref<36x128xbf16, #tpu.memory_space<vmem>>, vector<36x128xbf16>
    %cst = arith.constant dense<0.000000e+00> : vector<512x128xf32>
    %2 = tpu.matmul %0, %1, %cst {dimension_numbers = #tpu.dot_dimension_numbers<[1], [0], [0], [1], [0, 0, 1, 1], [], []>} : vector<512x36xbf16>, vector<36x128xbf16>, vector<512x128xf32> -> vector<512x128xf32>
    %c0_3 = arith.constant 0 : index
    %c0_4 = arith.constant 0 : index
    %3 = vector.load %arg3[%c0_3, %c0_4] : memref<1x128xf32, #tpu.memory_space<vmem>>, vector<1x128xf32>
    %4 = vector.broadcast %3 : vector<1x128xf32> to vector<512x128xf32>
    %5 = arith.addf %2, %4 : vector<512x128xf32>
    %cst_5 = arith.constant 0.000000e+00 : f32
    %6 = vector.broadcast %cst_5 : f32 to vector<512x128xf32>
    %7 = arith.maximumf %5, %6 : vector<512x128xf32>
    %c0_6 = arith.constant 0 : index
    %c0_7 = arith.constant 0 : index
    %8 = vector.load %arg4[%c0_6, %c0_7] : memref<512x128xf32, #tpu.memory_space<vmem>>, vector<512x128xf32>
    tpu.vector_store %arg4[%c0_6, %c0_7], %7 {strides = array<i32>} : memref<512x128xf32, #tpu.memory_space<vmem>>, vector<512x128xf32>,
    %c512_i32 = arith.constant 512 : i32
    %9 = arith.muli %arg0, %c512_i32 : i32
    %10 = tpu.iota {dimensions = array<i32: 0>} : vector<512x1xi32>
    %11 = vector.broadcast %9 : i32 to vector<512x1xi32>
    %12 = arith.addi %11, %10 : vector<512x1xi32>
    %c512_i32_8 = arith.constant 512 : i32
    %13 = vector.broadcast %c512_i32_8 : i32 to vector<512x1xi32>
    %14 = arith.cmpi slt, %12, %13 : vector<512x1xi32>
    %cst_9 = arith.constant 0.000000e+00 : f32
    %15 = vector.shape_cast %14 : vector<512x1xi1> to vector<512x1xi1>
    %16 = vector.broadcast %15 : vector<512x1xi1> to vector<512x128xi1>
    %17 = vector.broadcast %cst_9 : f32 to vector<512x128xf32>
    %18 = arith.select %16, %7, %17 : vector<512x128xi1>, vector<512x128xf32>
    %cst_10 = arith.constant dense<0.000000e+00> : vector<128xf32>
    %19 = vector.multi_reduction <add>, %18, %cst_10 [0] : vector<512x128xf32> to vector<128xf32>
    %20 = vector.shape_cast %19 : vector<128xf32> to vector<1x128xf32>
    %21 = arith.mulf %18, %18 : vector<512x128xf32>
    %cst_11 = arith.constant dense<0.000000e+00> : vector<128xf32>
    %22 = vector.multi_reduction <add>, %21, %cst_11 [0] : vector<512x128xf32> to vector<128xf32>
    %23 = vector.shape_cast %22 : vector<128xf32> to vector<1x128xf32>
    %24 = tpu.iota {dimensions = array<i32: 0>} : vector<8x1xi32>
    %c0_i32 = arith.constant 0 : i32
    %25 = vector.broadcast %c0_i32 : i32 to vector<8x1xi32>
    %26 = arith.cmpi eq, %24, %25 : vector<8x1xi32>
    %c1_i32 = arith.constant 1 : i32
    %27 = vector.broadcast %c1_i32 : i32 to vector<8x1xi32>
    %28 = arith.cmpi eq, %24, %27 : vector<8x1xi32>
    %cst_12 = arith.constant 0.000000e+00 : f32
    %29 = vector.shape_cast %28 : vector<8x1xi1> to vector<8x1xi1>
    %30 = vector.broadcast %29 : vector<8x1xi1> to vector<8x128xi1>
    %31 = vector.shape_cast %23 : vector<1x128xf32> to vector<1x128xf32>
    %32 = vector.broadcast %31 : vector<1x128xf32> to vector<8x128xf32>
    %33 = vector.broadcast %cst_12 : f32 to vector<8x128xf32>
    %34 = arith.select %30, %32, %33 : vector<8x128xi1>, vector<8x128xf32>
    %35 = vector.shape_cast %26 : vector<8x1xi1> to vector<8x1xi1>
    %36 = vector.broadcast %35 : vector<8x1xi1> to vector<8x128xi1>
    %37 = vector.shape_cast %20 : vector<1x128xf32> to vector<1x128xf32>
    %38 = vector.broadcast %37 : vector<1x128xf32> to vector<8x128xf32>
    %39 = arith.select %36, %38, %34 : vector<8x128xi1>, vector<8x128xf32>
    %c0_13 = arith.constant 0 : index
    %c0_14 = arith.constant 0 : index
    %40 = vector.load %arg5[%c0_13, %c0_14] : memref<8x128xf32, #tpu.memory_space<vmem>>, vector<8x128xf32>
    tpu.vector_store %arg5[%c0_13, %c0_14], %39 {strides = array<i32>} : memref<8x128xf32, #tpu.memory_space<vmem>>, vector<8x128xf32>,
    return
  }
  func.func @transform_0(%arg0: i32) -> (i32, i32) {
    %c0_i32 = arith.constant 0 : i32
    %c0_i32_0 = arith.constant 0 : i32
    return %arg0, %c0_i32 : i32, i32
  }
  func.func @transform_1(%arg0: i32) -> (i32, i32) {
    %c0_i32 = arith.constant 0 : i32
    %c0_i32_0 = arith.constant 0 : i32
    %c0_i32_1 = arith.constant 0 : i32
    return %c0_i32, %c0_i32_0 : i32, i32
  }
  func.func @transform_2(%arg0: i32) -> (i32, i32) {
    %c0_i32 = arith.constant 0 : i32
    %c0_i32_0 = arith.constant 0 : i32
    %c0_i32_1 = arith.constant 0 : i32
    return %c0_i32, %c0_i32_0 : i32, i32
  }
  func.func @transform_3(%arg0: i32) -> (i32, i32) {
    %c0_i32 = arith.constant 0 : i32
    %c0_i32_0 = arith.constant 0 : i32
    return %arg0, %c0_i32 : i32, i32
  }
  func.func @transform_4(%arg0: i32) -> (i32, i32) {
    %c0_i32 = arith.constant 0 : i32
    %c0_i32_0 = arith.constant 0 : i32
    return %arg0, %c0_i32 : i32, i32
  }
}

module attributes {stable_mosaic.version = 11 : i64} {
  func.func @_conv_relu_stats_kernel(%arg0: i32, %arg1: memref<512x72xbf16, #tpu.memory_space<vmem>>, %arg2: memref<72x128xbf16, #tpu.memory_space<vmem>>, %arg3: memref<1x128xf32, #tpu.memory_space<vmem>>, %arg4: memref<512x128xf32, #tpu.memory_space<vmem>>, %arg5: memref<8x128xf32, #tpu.memory_space<vmem>>) attributes {dimension_semantics = [#tpu.dimension_semantics<parallel>], iteration_bounds = array<i64: 1>, scalar_prefetch = 0 : i64, scratch_operands = 0 : i64, tpu.core_type = #tpu.core_type<tc>, window_params = [{transform_indices = @transform_0, window_bounds = array<i64: 512, 72>}, {pipeline_mode = #tpu.pipeline_mode<synchronous>, transform_indices = @transform_1, window_bounds = array<i64: 72, 128>}, {pipeline_mode = #tpu.pipeline_mode<synchronous>, transform_indices = @transform_2, window_bounds = array<i64: 1, 128>}, {transform_indices = @transform_3, window_bounds = array<i64: 512, 128>}, {transform_indices = @transform_4, window_bounds = array<i64: 8, 128>}]} {
    %c0 = arith.constant 0 : index
    %c0_0 = arith.constant 0 : index
    %0 = vector.load %arg1[%c0, %c0_0] : memref<512x72xbf16, #tpu.memory_space<vmem>>, vector<512x72xbf16>
    %c0_1 = arith.constant 0 : index
    %c0_2 = arith.constant 0 : index
    %1 = vector.load %arg2[%c0_1, %c0_2] : memref<72x128xbf16, #tpu.memory_space<vmem>>, vector<72x128xbf16>
    %cst = arith.constant dense<0.000000e+00> : vector<512x128xf32>
    %2 = tpu.matmul %0, %1, %cst {dimension_numbers = #tpu.dot_dimension_numbers<[1], [0], [0], [1], [0, 0, 1, 1], [], []>} : vector<512x72xbf16>, vector<72x128xbf16>, vector<512x128xf32> -> vector<512x128xf32>
    %c0_3 = arith.constant 0 : index
    %c0_4 = arith.constant 0 : index
    %3 = vector.load %arg3[%c0_3, %c0_4] : memref<1x128xf32, #tpu.memory_space<vmem>>, vector<1x128xf32>
    %4 = vector.broadcast %3 : vector<1x128xf32> to vector<512x128xf32>
    %5 = arith.addf %2, %4 : vector<512x128xf32>
    %cst_5 = arith.constant 0.000000e+00 : f32
    %6 = vector.broadcast %cst_5 : f32 to vector<512x128xf32>
    %7 = arith.maximumf %5, %6 : vector<512x128xf32>
    %c0_6 = arith.constant 0 : index
    %c0_7 = arith.constant 0 : index
    %8 = vector.load %arg4[%c0_6, %c0_7] : memref<512x128xf32, #tpu.memory_space<vmem>>, vector<512x128xf32>
    tpu.vector_store %arg4[%c0_6, %c0_7], %7 {strides = array<i32>} : memref<512x128xf32, #tpu.memory_space<vmem>>, vector<512x128xf32>,
    %c512_i32 = arith.constant 512 : i32
    %9 = arith.muli %arg0, %c512_i32 : i32
    %10 = tpu.iota {dimensions = array<i32: 0>} : vector<512x1xi32>
    %11 = vector.broadcast %9 : i32 to vector<512x1xi32>
    %12 = arith.addi %11, %10 : vector<512x1xi32>
    %c512_i32_8 = arith.constant 512 : i32
    %13 = vector.broadcast %c512_i32_8 : i32 to vector<512x1xi32>
    %14 = arith.cmpi slt, %12, %13 : vector<512x1xi32>
    %cst_9 = arith.constant 0.000000e+00 : f32
    %15 = vector.shape_cast %14 : vector<512x1xi1> to vector<512x1xi1>
    %16 = vector.broadcast %15 : vector<512x1xi1> to vector<512x128xi1>
    %17 = vector.broadcast %cst_9 : f32 to vector<512x128xf32>
    %18 = arith.select %16, %7, %17 : vector<512x128xi1>, vector<512x128xf32>
    %cst_10 = arith.constant dense<0.000000e+00> : vector<128xf32>
    %19 = vector.multi_reduction <add>, %18, %cst_10 [0] : vector<512x128xf32> to vector<128xf32>
    %20 = vector.shape_cast %19 : vector<128xf32> to vector<1x128xf32>
    %21 = arith.mulf %18, %18 : vector<512x128xf32>
    %cst_11 = arith.constant dense<0.000000e+00> : vector<128xf32>
    %22 = vector.multi_reduction <add>, %21, %cst_11 [0] : vector<512x128xf32> to vector<128xf32>
    %23 = vector.shape_cast %22 : vector<128xf32> to vector<1x128xf32>
    %24 = tpu.iota {dimensions = array<i32: 0>} : vector<8x1xi32>
    %c0_i32 = arith.constant 0 : i32
    %25 = vector.broadcast %c0_i32 : i32 to vector<8x1xi32>
    %26 = arith.cmpi eq, %24, %25 : vector<8x1xi32>
    %c1_i32 = arith.constant 1 : i32
    %27 = vector.broadcast %c1_i32 : i32 to vector<8x1xi32>
    %28 = arith.cmpi eq, %24, %27 : vector<8x1xi32>
    %cst_12 = arith.constant 0.000000e+00 : f32
    %29 = vector.shape_cast %28 : vector<8x1xi1> to vector<8x1xi1>
    %30 = vector.broadcast %29 : vector<8x1xi1> to vector<8x128xi1>
    %31 = vector.shape_cast %23 : vector<1x128xf32> to vector<1x128xf32>
    %32 = vector.broadcast %31 : vector<1x128xf32> to vector<8x128xf32>
    %33 = vector.broadcast %cst_12 : f32 to vector<8x128xf32>
    %34 = arith.select %30, %32, %33 : vector<8x128xi1>, vector<8x128xf32>
    %35 = vector.shape_cast %26 : vector<8x1xi1> to vector<8x1xi1>
    %36 = vector.broadcast %35 : vector<8x1xi1> to vector<8x128xi1>
    %37 = vector.shape_cast %20 : vector<1x128xf32> to vector<1x128xf32>
    %38 = vector.broadcast %37 : vector<1x128xf32> to vector<8x128xf32>
    %39 = arith.select %36, %38, %34 : vector<8x128xi1>, vector<8x128xf32>
    %c0_13 = arith.constant 0 : index
    %c0_14 = arith.constant 0 : index
    %40 = vector.load %arg5[%c0_13, %c0_14] : memref<8x128xf32, #tpu.memory_space<vmem>>, vector<8x128xf32>
    tpu.vector_store %arg5[%c0_13, %c0_14], %39 {strides = array<i32>} : memref<8x128xf32, #tpu.memory_space<vmem>>, vector<8x128xf32>,
    return
  }
  func.func @transform_0(%arg0: i32) -> (i32, i32) {
    %c0_i32 = arith.constant 0 : i32
    %c0_i32_0 = arith.constant 0 : i32
    return %arg0, %c0_i32 : i32, i32
  }
  func.func @transform_1(%arg0: i32) -> (i32, i32) {
    %c0_i32 = arith.constant 0 : i32
    %c0_i32_0 = arith.constant 0 : i32
    %c0_i32_1 = arith.constant 0 : i32
    return %c0_i32, %c0_i32_0 : i32, i32
  }
  func.func @transform_2(%arg0: i32) -> (i32, i32) {
    %c0_i32 = arith.constant 0 : i32
    %c0_i32_0 = arith.constant 0 : i32
    %c0_i32_1 = arith.constant 0 : i32
    return %c0_i32, %c0_i32_0 : i32, i32
  }
  func.func @transform_3(%arg0: i32) -> (i32, i32) {
    %c0_i32 = arith.constant 0 : i32
    %c0_i32_0 = arith.constant 0 : i32
    return %arg0, %c0_i32 : i32, i32
  }
  func.func @transform_4(%arg0: i32) -> (i32, i32) {
    %c0_i32 = arith.constant 0 : i32
    %c0_i32_0 = arith.constant 0 : i32
    return %arg0, %c0_i32 : i32, i32
  }
}

</mosaic_0001>

<bundles_post_ra>
// kernel: unet_conv_block.2
= control target key start
LH: loop header
LB: loop body
LE: loop exit
PB: predicated region body
PF: predicated region fallthrough
CT: control target
= control target key end

     0   :  { %vm362_vm0 = vcmask 1041408   ;;  %vm265_vm1 = vcmask 293888   ;;  %s2237_s1 = inlined_call_operand.vmem [shape: bf16[36,128], index: 1, kind: input, shape index: {}]   ;;  %s2238_s2 = inlined_call_operand.vmem [shape: f32[1,128], index: 2, kind: input, shape index: {}]   ;;  %s2239_s0 = inlined_call_operand.vmem [shape: bf16[512,36], index: 0, kind: input, shape index: {}]   ;;  %s2240_s3 = inlined_call_operand.vmem [shape: f32[512,128], index: 3, kind: output, shape index: {0}]   ;;  %s2241_s4 = inlined_call_operand.vmem [shape: f32[8,128], index: 4, kind: output, shape index: {1}]  }
   0x1   :  { %v85_v0 = vld [vmem:[%s2237_s1 + $0x10] sm:$0x3]  ;;  %v1470_v4 = vld [vmem:[%s2237_s1 + $0x8] sm:$0xff]  ;;  %v1469_v5 = vld [vmem:[%s2237_s1] sm:$0xff] }
   0x2   :  { %v259_v1 = vunpack.c.l.b16 %v85_v0  ;;  %v1437_v6 = vld [vmem:[%s2239_s0] sm:$0xff]  ;;  %v1438_v8 = vld [vmem:[%s2239_s0 + $0x8] sm:$0xff]  ;;  %v1439_v11 = vld [vmem:[%s2239_s0 + $0x10] sm:$0xff] }
   0x3   :  { %v1445_v7 = vld [vmem:[%s2239_s0 + $0x40] sm:$0xff]  ;;  %v1446_v9 = vld [vmem:[%s2239_s0 + $0x48] sm:$0xff]  ;;  %v1447_v12 = vld [vmem:[%s2239_s0 + $0x50] sm:$0xff] }
   0x4   :  { %v262_v2 = vpack.c.b16 %v259_v1, %v259_v1  ;;  %v1453_v10 = vld [vmem:[%s2239_s0 + $0x80] sm:$0xff]  ;;  %v1454_v13 = vld [vmem:[%s2239_s0 + $0x88] sm:$0xff]  ;;  %v1440_v14 = vld [vmem:[%s2239_s0 + $0x18] sm:$0xff] }
   0x5   :  { %v1448_v15 = vld [vmem:[%s2239_s0 + $0x58] sm:$0xff]  ;;  %v1455_v16 = vld [vmem:[%s2239_s0 + $0x90] sm:$0xff]  ;;  %v1461_v17 = vld [vmem:[%s2239_s0 + $0xc0] sm:$0xff] }
   0x6   :  { %v364_v3 = vsel %vm362_vm0, %v262_v2, 0  ;;  %v1441_v18 = vld [vmem:[%s2239_s0 + $0x20] sm:$0xff]  ;;  %v1456_v20 = vld [vmem:[%s2239_s0 + $0x98] sm:$0xff]  ;;  %v1462_v21 = vld [vmem:[%s2239_s0 + $0xc8] sm:$0xff] }
   0x7   :  { %371 = vmatpush.bf16.msra.mxu0 %v364_v3  ;;  %1471 = vmatpush.bf16.msra.mxu1 %v364_v3  ;;  %v1449_v19 = vld [vmem:[%s2239_s0 + $0x60] sm:$0xff]  ;;  %v1442_v22 = vld [vmem:[%s2239_s0 + $0x28] sm:$0xff]  ;;  %v1463_v25 = vld [vmem:[%s2239_s0 + $0xd0] sm:$0xff] }
   0x8   :  { %1472 = vmatpush.bf16.msra.mxu2 %v364_v3  ;;  %1473 = vmatpush.bf16.msra.mxu3 %v364_v3  ;;  %v1450_v23 = vld [vmem:[%s2239_s0 + $0x68] sm:$0xff]  ;;  %v1457_v24 = vld [vmem:[%s2239_s0 + $0xa0] sm:$0xff]  ;;  %v1443_v26 = vld [vmem:[%s2239_s0 + $0x30] sm:$0xff] }
   0x9   :  { %v1451_v27 = vld [vmem:[%s2239_s0 + $0x70] sm:$0xff]  ;;  %v1458_v28 = vld [vmem:[%s2239_s0 + $0xa8] sm:$0xff]  ;;  %v1464_v29 = vld [vmem:[%s2239_s0 + $0xd8] sm:$0xff] }
   0xa   :  { %v1444_v30 = vld [vmem:[%s2239_s0 + $0x38] sm:$0xff]  ;;  %v1459_v32 = vld [vmem:[%s2239_s0 + $0xb0] sm:$0xff]  ;;  %v1465_v33 = vld [vmem:[%s2239_s0 + $0xe0] sm:$0xff] }
   0xb   :  { %372 = vmatpush.bf16.msra.mxu0 %v1470_v4  ;;  %1474 = vmatpush.bf16.msra.mxu1 %v1470_v4  ;;  %v1452_v31 = vld [vmem:[%s2239_s0 + $0x78] sm:$0xff]  ;;  %v1630_v34 = vld [vmem:[%s2238_s2] ss:$0 sm:$0xff]  ;;  %v1466_v42 = vld [vmem:[%s2239_s0 + $0xe8] sm:$0xff] }
   0xc   :  { %1475 = vmatpush.bf16.msra.mxu2 %v1470_v4  ;;  %1476 = vmatpush.bf16.msra.mxu3 %v1470_v4  ;;  %v1460_v41 = vld [vmem:[%s2239_s0 + $0xb8] sm:$0xff]  ;;  %v1467_v59 = vld [vmem:[%s2239_s0 + $0xf0] sm:$0xff] }
   0xf   :  { %373 = vmatpush.bf16.msra.mxu0 %v1469_v5  ;;  %1477 = vmatpush.bf16.msra.mxu1 %v1469_v5 }
  0x10   :  { %1478 = vmatpush.bf16.msra.mxu2 %v1469_v5  ;;  %1479 = vmatpush.bf16.msra.mxu3 %v1469_v5 }
  0x12   :  { %1405 = vmatmul.msk.bf16.vlgmr.msra.gmra.mxu0 %vm265_vm1, %v1437_v6  ;;  %1413 = vmatmul.msk.bf16.vlgmr.msra.gmra.mxu1 %vm265_vm1, %v1445_v7 }
  0x13   :  { %1421 = vmatmul.msk.bf16.vlgmr.msra.gmra.mxu2 %vm265_vm1, %v1453_v10  ;;  %1429 = vmatmul.msk.bf16.vlgmr.msra.gmra.mxu3 %vm265_vm1, %v1461_v17 }
  0x22   :  { %1406 = vmatmul.msk.bf16.gmra.mxu0 %vm265_vm1, %v1438_v8  ;;  %1414 = vmatmul.msk.bf16.gmra.mxu1 %vm265_vm1, %v1446_v9 }
  0x23   :  { %1422 = vmatmul.msk.bf16.gmra.mxu2 %vm265_vm1, %v1454_v13  ;;  %1430 = vmatmul.msk.bf16.gmra.mxu3 %vm265_vm1, %v1462_v21 }
  0x32   :  { %1407 = vmatmul.msk.bf16.gmra.mxu0 %vm265_vm1, %v1439_v11  ;;  %1415 = vmatmul.msk.bf16.gmra.mxu1 %vm265_vm1, %v1447_v12 }
  0x33   :  { %1423 = vmatmul.msk.bf16.gmra.mxu2 %vm265_vm1, %v1455_v16  ;;  %1431 = vmatmul.msk.bf16.gmra.mxu3 %vm265_vm1, %v1463_v25 }
  0x42   :  { %1408 = vmatmul.msk.bf16.gmra.mxu0 %vm265_vm1, %v1440_v14  ;;  %1416 = vmatmul.msk.bf16.gmra.mxu1 %vm265_vm1, %v1448_v15 }
  0x43   :  { %1424 = vmatmul.msk.bf16.gmra.mxu2 %vm265_vm1, %v1456_v20  ;;  %1432 = vmatmul.msk.bf16.gmra.mxu3 %vm265_vm1, %v1464_v29 }
  0x52   :  { %1409 = vmatmul.msk.bf16.gmra.mxu0 %vm265_vm1, %v1441_v18  ;;  %1417 = vmatmul.msk.bf16.gmra.mxu1 %vm265_vm1, %v1449_v19  ;;  %v1468_v19 = vld [vmem:[%s2239_s0 + $0xf8] sm:$0xff] }
  0x53   :  { %1425 = vmatmul.msk.bf16.gmra.mxu2 %vm265_vm1, %v1457_v24  ;;  %1433 = vmatmul.msk.bf16.gmra.mxu3 %vm265_vm1, %v1465_v33 }
  0x62   :  { %1410 = vmatmul.msk.bf16.gmra.mxu0 %vm265_vm1, %v1442_v22  ;;  %1418 = vmatmul.msk.bf16.gmra.mxu1 %vm265_vm1, %v1450_v23 }
  0x63   :  { %1426 = vmatmul.msk.bf16.gmra.mxu2 %vm265_vm1, %v1458_v28  ;;  %1434 = vmatmul.msk.bf16.gmra.mxu3 %vm265_vm1, %v1466_v42 }
  0x72   :  { %1411 = vmatmul.msk.bf16.gmra.mxu0 %vm265_vm1, %v1443_v26  ;;  %1419 = vmatmul.msk.bf16.gmra.mxu1 %vm265_vm1, %v1451_v27 }
  0x73   :  { %1427 = vmatmul.msk.bf16.gmra.mxu2 %vm265_vm1, %v1459_v32  ;;  %1435 = vmatmul.msk.bf16.gmra.mxu3 %vm265_vm1, %v1467_v59 }
  0x82   :  { %1412 = vmatmul.msk.bf16.gmra.mxu0 %vm265_vm1, %v1444_v30  ;;  %1420 = vmatmul.msk.bf16.gmra.mxu1 %vm265_vm1, %v1452_v31 }
  0x83   :  { %1428 = vmatmul.msk.bf16.gmra.mxu2 %vm265_vm1, %v1460_v41  ;;  %1436 = vmatmul.msk.bf16.gmra.mxu3 %vm265_vm1, %v1468_v19 }
  0x8f   :  { %v375_v35 = vpop.f32.mrf.mxu0  ;;  %v415_v36 = vpop.f32.mrf.mxu1 }
  0x90   :  { %v376_v37 = vadd.f32 %v1630_v34, %v375_v35  ;;  %v416_v38 = vadd.f32 %v1630_v34, %v415_v36 }
  0x92   :  { %v535_v39 = vmax.f32 %v376_v37, 0.0  ;;  %v1634_v40 = vmax.f32 %v416_v38, 0.0 }
  0x94   :  { %599 = vst [vmem:[%s2240_s3] sm:$0xff] %v535_v39  ;;  %v1119_v49 = vmul.f32 %v535_v39, %v535_v39 }
  0x95   :  { %615 = vst [vmem:[%s2240_s3 + $0x80] sm:$0xff] %v1634_v40 }
  0x96   :  { %v455_v3 = vpop.f32.mrf.mxu2 }
  0x97   :  { %v377_v43 = vpop.f32.mrf.mxu0  ;;  %v417_v44 = vpop.f32.mrf.mxu1  ;;  %v456_v9 = vadd.f32 %v1630_v34, %v455_v3 }
  0x98   :  { %v378_v45 = vadd.f32 %v1630_v34, %v377_v43  ;;  %v418_v46 = vadd.f32 %v1630_v34, %v417_v44 }
  0x99   :  { %v1691_v14 = vmax.f32 %v456_v9, 0.0 }
  0x9a   :  { %v536_v47 = vmax.f32 %v378_v45, 0.0  ;;  %v1653_v48 = vmax.f32 %v418_v46, 0.0 }
  0x9b   :  { %631 = vst [vmem:[%s2240_s3 + $0x100] sm:$0xff] %v1691_v14 }
  0x9c   :  { %600 = vst [vmem:[%s2240_s3 + $0x8] sm:$0xff] %v536_v47  ;;  %v1050_v50 = vadd.f32 %v536_v47, %v535_v39  ;;  %v1120_v51 = vmul.f32 %v536_v47, %v536_v47 }
  0x9d   :  { %616 = vst [vmem:[%s2240_s3 + $0x88] sm:$0xff] %v1653_v48 }
  0x9e   :  { %v1183_v52 = vadd.f32 %v1120_v51, %v1119_v49  ;;  %v457_v15 = vpop.f32.mrf.mxu2  ;;  %v495_v51 = vpop.f32.mrf.mxu3 }
  0x9f   :  { %v380_v53 = vpop.f32.mrf.mxu0  ;;  %v420_v54 = vpop.f32.mrf.mxu1  ;;  %v458_v16 = vadd.f32 %v1630_v34, %v457_v15 }
  0xa0   :  { %v381_v55 = vadd.f32 %v1630_v34, %v380_v53  ;;  %v421_v56 = vadd.f32 %v1630_v34, %v420_v54 }
  0xa1   :  { %v1703_v20 = vmax.f32 %v458_v16, 0.0 }
  0xa2   :  { %v537_v57 = vmax.f32 %v381_v55, 0.0  ;;  %v1664_v58 = vmax.f32 %v421_v56, 0.0  ;;  %v496_v55 = vadd.f32 %v1630_v34, %v495_v51 }
  0xa3   :  { %632 = vst [vmem:[%s2240_s3 + $0x108] sm:$0xff] %v1703_v20 }
  0xa4   :  { %601 = vst [vmem:[%s2240_s3 + $0x10] sm:$0xff] %v537_v57  ;;  %v1051_v60 = vadd.f32 %v1050_v50, %v537_v57  ;;  %v1121_v61 = vmul.f32 %v537_v57, %v537_v57 }
  0xa5   :  { %617 = vst [vmem:[%s2240_s3 + $0x90] sm:$0xff] %v1664_v58 }
  0xa6   :  { %v1184_v62 = vadd.f32 %v1183_v52, %v1121_v61  ;;  %v460_v28 = vpop.f32.mrf.mxu2 }
  0xa7   :  { %v382_v63 = vpop.f32.mrf.mxu0  ;;  %v422_v0 = vpop.f32.mrf.mxu1  ;;  %v461_v32 = vadd.f32 %v1630_v34, %v460_v28 }
  0xa8   :  { %v383_v1 = vadd.f32 %v1630_v34, %v382_v63  ;;  %v423_v2 = vadd.f32 %v1630_v34, %v422_v0  ;;  %v497_v0 = vpop.f32.mrf.mxu3 }
  0xa9   :  { %v1739_v38 = vmax.f32 %v461_v32, 0.0 }
  0xaa   :  { %v538_v4 = vmax.f32 %v383_v1, 0.0  ;;  %v1679_v5 = vmax.f32 %v423_v2, 0.0  ;;  %v498_v2 = vadd.f32 %v1630_v34, %v497_v0 }
  0xab   :  { %633 = vst [vmem:[%s2240_s3 + $0x110] sm:$0xff] %v1739_v38 }
  0xac   :  { %602 = vst [vmem:[%s2240_s3 + $0x18] sm:$0xff] %v538_v4  ;;  %v1052_v6 = vadd.f32 %v1051_v60, %v538_v4  ;;  %v1122_v7 = vmul.f32 %v538_v4, %v538_v4 }
  0xad   :  { %618 = vst [vmem:[%s2240_s3 + $0x98] sm:$0xff] %v1679_v5 }
  0xae   :  { %v1185_v8 = vadd.f32 %v1184_v62, %v1122_v7  ;;  %v462_v39 = vpop.f32.mrf.mxu2  ;;  %v1784_v62 = vmax.f32 %v496_v55, 0.0  ;;  %v1802_v7 = vmax.f32 %v498_v2, 0.0 }
  0xaf   :  { %v385_v10 = vpop.f32.mrf.mxu0  ;;  %v425_v11 = vpop.f32.mrf.mxu1  ;;  %v463_v41 = vadd.f32 %v1630_v34, %v462_v39 }
  0xb0   :  { %v386_v12 = vadd.f32 %v1630_v34, %v385_v10  ;;  %v426_v13 = vadd.f32 %v1630_v34, %v425_v11  ;;  %647 = vst [vmem:[%s2240_s3 + $0x180] sm:$0xff] %v1784_v62 }
  0xb1   :  { %v1750_v44 = vmax.f32 %v463_v41, 0.0  ;;  %648 = vst [vmem:[%s2240_s3 + $0x188] sm:$0xff] %v1802_v7 }
  0xb2   :  { %v539_v17 = vmax.f32 %v386_v12, 0.0  ;;  %v1694_v18 = vmax.f32 %v426_v13, 0.0  ;;  %v500_v13 = vpop.f32.mrf.mxu3 }
  0xb3   :  { %634 = vst [vmem:[%s2240_s3 + $0x118] sm:$0xff] %v1750_v44  ;;  %v501_v19 = vadd.f32 %v1630_v34, %v500_v13 }
  0xb4   :  { %603 = vst [vmem:[%s2240_s3 + $0x20] sm:$0xff] %v539_v17  ;;  %v1053_v21 = vadd.f32 %v1052_v6, %v539_v17  ;;  %v1123_v22 = vmul.f32 %v539_v17, %v539_v17 }
  0xb5   :  { %619 = vst [vmem:[%s2240_s3 + $0xa0] sm:$0xff] %v1694_v18 }
  0xb6   :  { %v1713_v23 = vadd.f32 %v1185_v8, %v1123_v22  ;;  %v465_v50 = vpop.f32.mrf.mxu2 }
  0xb7   :  { %v387_v24 = vpop.f32.mrf.mxu0  ;;  %v427_v25 = vpop.f32.mrf.mxu1  ;;  %v466_v54 = vadd.f32 %v1630_v34, %v465_v50 }
  0xb8   :  { %v388_v26 = vadd.f32 %v1630_v34, %v387_v24  ;;  %v428_v27 = vadd.f32 %v1630_v34, %v427_v25 }
  0xb9   :  { %v1782_v61 = vmax.f32 %v466_v54, 0.0 }
  0xba   :  { %v1721_v29 = vmax.f32 %v388_v26, 0.0  ;;  %v1723_v30 = vmax.f32 %v428_v27, 0.0  ;;  %v1840_v27 = vmax.f32 %v501_v19, 0.0  ;;  %v502_v32 = vpop.f32.mrf.mxu3 }
  0xbb   :  { %635 = vst [vmem:[%s2240_s3 + $0x120] sm:$0xff] %v1782_v61 }
  0xbc   :  { %604 = vst [vmem:[%s2240_s3 + $0x28] sm:$0xff] %v1721_v29  ;;  %v1730_v31 = vadd.f32 %v1053_v21, %v1721_v29  ;;  %v1124_v19 = vmul.f32 %v1721_v29, %v1721_v29 }
  0xbd   :  { %620 = vst [vmem:[%s2240_s3 + $0xa8] sm:$0xff] %v1723_v30 }
  0xbe   :  { %v467_v63 = vpop.f32.mrf.mxu2  ;;  %649 = vst [vmem:[%s2240_s3 + $0x190] sm:$0xff] %v1840_v27 }
  0xbf   :  { %v390_v33 = vpop.f32.mrf.mxu0  ;;  %v430_v35 = vpop.f32.mrf.mxu1  ;;  %v468_v1 = vadd.f32 %v1630_v34, %v467_v63 }
  0xc0   :  { %v391_v36 = vadd.f32 %v1630_v34, %v390_v33  ;;  %v431_v37 = vadd.f32 %v1630_v34, %v430_v35  ;;  %v503_v35 = vadd.f32 %v1630_v34, %v502_v32 }
  0xc1   :  { %v1800_v6 = vmax.f32 %v468_v1, 0.0 }
  0xc2   :  { %v1742_v42 = vmax.f32 %v391_v36, 0.0  ;;  %v1744_v43 = vmax.f32 %v431_v37, 0.0  ;;  %v1858_v41 = vmax.f32 %v503_v35, 0.0  ;;  %v505_v51 = vpop.f32.mrf.mxu3  ;;  %v1187_v35 = vadd.f32 %v1713_v23, %v1124_v19 }
  0xc3   :  { %636 = vst [vmem:[%s2240_s3 + $0x128] sm:$0xff] %v1800_v6  ;;  %v506_v0 = vadd.f32 %v1630_v34, %v505_v51 }
  0xc4   :  { %605 = vst [vmem:[%s2240_s3 + $0x30] sm:$0xff] %v1742_v42 }
  0xc5   :  { %621 = vst [vmem:[%s2240_s3 + $0xb0] sm:$0xff] %v1744_v43  ;;  %v1900_v13 = vmax.f32 %v506_v0, 0.0 }
  0xc6   :  { %v470_v12 = vpop.f32.mrf.mxu2  ;;  %650 = vst [vmem:[%s2240_s3 + $0x198] sm:$0xff] %v1858_v41 }
  0xc7   :  { %v392_v45 = vpop.f32.mrf.mxu0  ;;  %v432_v46 = vpop.f32.mrf.mxu1  ;;  %v471_v17 = vadd.f32 %v1630_v34, %v470_v12  ;;  %651 = vst [vmem:[%s2240_s3 + $0x1a0] sm:$0xff] %v1900_v13 }
  0xc8   :  { %v393_v47 = vadd.f32 %v1630_v34, %v392_v45  ;;  %v433_v49 = vadd.f32 %v1630_v34, %v432_v46 }
  0xc9   :  { %v1838_v26 = vmax.f32 %v471_v17, 0.0 }
  0xca   :  { %v1766_v52 = vmax.f32 %v393_v47, 0.0  ;;  %v1768_v53 = vmax.f32 %v433_v49, 0.0  ;;  %v507_v2 = vpop.f32.mrf.mxu3 }
  0xcb   :  { %637 = vst [vmem:[%s2240_s3 + $0x130] sm:$0xff] %v1838_v26 }
  0xcc   :  { %606 = vst [vmem:[%s2240_s3 + $0x38] sm:$0xff] %v1766_v52 }
  0xcd   :  { %622 = vst [vmem:[%s2240_s3 + $0xb8] sm:$0xff] %v1768_v53 }
  0xce   :  { %v472_v28 = vpop.f32.mrf.mxu2 }
  0xcf   :  { %v395_v56 = vpop.f32.mrf.mxu0  ;;  %v435_v57 = vpop.f32.mrf.mxu1  ;;  %v473_v33 = vadd.f32 %v1630_v34, %v472_v28 }
  0xd0   :  { %v396_v59 = vadd.f32 %v1630_v34, %v395_v56  ;;  %v436_v60 = vadd.f32 %v1630_v34, %v435_v57 }
  0xd1   :  { %v1856_v39 = vmax.f32 %v473_v33, 0.0 }
  0xd2   :  { %v1788_v3 = vmax.f32 %v396_v59, 0.0  ;;  %v1790_v4 = vmax.f32 %v436_v60, 0.0  ;;  %v510_v33 = vpop.f32.mrf.mxu3 }
  0xd3   :  { %638 = vst [vmem:[%s2240_s3 + $0x138] sm:$0xff] %v1856_v39 }
  0xd4   :  { %607 = vst [vmem:[%s2240_s3 + $0x40] sm:$0xff] %v1788_v3  ;;  %v1127_v23 = vmul.f32 %v1788_v3, %v1788_v3 }
  0xd5   :  { %623 = vst [vmem:[%s2240_s3 + $0xc0] sm:$0xff] %v1790_v4 }
  0xd6   :  { %v475_v50 = vpop.f32.mrf.mxu2 }
  0xd7   :  { %v397_v8 = vpop.f32.mrf.mxu0  ;;  %v437_v9 = vpop.f32.mrf.mxu1  ;;  %v476_v63 = vadd.f32 %v1630_v34, %v475_v50 }
  0xd8   :  { %v398_v10 = vadd.f32 %v1630_v34, %v397_v8  ;;  %v438_v11 = vadd.f32 %v1630_v34, %v437_v9  ;;  %v508_v9 = vadd.f32 %v1630_v34, %v507_v2  ;;  %v511_v2 = vadd.f32 %v1630_v34, %v510_v33 }
  0xd9   :  { %v1898_v12 = vmax.f32 %v476_v63, 0.0 }
  0xda   :  { %v1822_v15 = vmax.f32 %v398_v10, 0.0  ;;  %v1824_v16 = vmax.f32 %v438_v11, 0.0  ;;  %v1971_v33 = vmax.f32 %v511_v2, 0.0 }
  0xdb   :  { %639 = vst [vmem:[%s2240_s3 + $0x140] sm:$0xff] %v1898_v12 }
  0xdc   :  { %608 = vst [vmem:[%s2240_s3 + $0x48] sm:$0xff] %v1822_v15 }
  0xdd   :  { %624 = vst [vmem:[%s2240_s3 + $0xc8] sm:$0xff] %v1824_v16 }
  0xde   :  { %v477_v1 = vpop.f32.mrf.mxu2  ;;  %653 = vst [vmem:[%s2240_s3 + $0x1b0] sm:$0xff] %v1971_v33 }
  0xdf   :  { %v400_v21 = vpop.f32.mrf.mxu0  ;;  %v440_v22 = vpop.f32.mrf.mxu1  ;;  %v478_v8 = vadd.f32 %v1630_v34, %v477_v1 }
  0xe0   :  { %v401_v24 = vadd.f32 %v1630_v34, %v400_v21  ;;  %v441_v25 = vadd.f32 %v1630_v34, %v440_v22  ;;  %v1913_v21 = vmax.f32 %v508_v9, 0.0  ;;  %v1125_v22 = vmul.f32 %v1742_v42, %v1742_v42  ;;  %v512_v9 = vpop.f32.mrf.mxu3 }
  0xe1   :  { %v1905_v17 = vmax.f32 %v478_v8, 0.0 }
  0xe2   :  { %v1844_v36 = vmax.f32 %v401_v24, 0.0  ;;  %v1846_v37 = vmax.f32 %v441_v25, 0.0  ;;  %652 = vst [vmem:[%s2240_s3 + $0x1a8] sm:$0xff] %v1913_v21  ;;  %v1188_v50 = vadd.f32 %v1187_v35, %v1125_v22 }
  0xe3   :  { %640 = vst [vmem:[%s2240_s3 + $0x148] sm:$0xff] %v1905_v17 }
  0xe4   :  { %609 = vst [vmem:[%s2240_s3 + $0x50] sm:$0xff] %v1844_v36 }
  0xe5   :  { %625 = vst [vmem:[%s2240_s3 + $0xd0] sm:$0xff] %v1846_v37 }
  0xe6   :  { %v480_v32 = vpop.f32.mrf.mxu2 }
  0xe7   :  { %v402_v45 = vpop.f32.mrf.mxu0  ;;  %v442_v46 = vpop.f32.mrf.mxu1  ;;  %v481_v1 = vadd.f32 %v1630_v34, %v480_v32 }
  0xe8   :  { %v403_v47 = vadd.f32 %v1630_v34, %v402_v45  ;;  %v443_v49 = vadd.f32 %v1630_v34, %v442_v46  ;;  %v1055_v45 = vadd.f32 %v1730_v31, %v1742_v42  ;;  %v1126_v46 = vmul.f32 %v1766_v52, %v1766_v52 }
  0xe9   :  { %v1969_v35 = vmax.f32 %v481_v1, 0.0 }
  0xea   :  { %v1878_v54 = vmax.f32 %v403_v47, 0.0  ;;  %v1880_v55 = vmax.f32 %v443_v49, 0.0  ;;  %v1056_v51 = vadd.f32 %v1055_v45, %v1766_v52  ;;  %v1189_v31 = vadd.f32 %v1188_v50, %v1126_v46 }
  0xeb   :  { %641 = vst [vmem:[%s2240_s3 + $0x150] sm:$0xff] %v1969_v35 }
  0xec   :  { %610 = vst [vmem:[%s2240_s3 + $0x58] sm:$0xff] %v1878_v54  ;;  %v1057_v42 = vadd.f32 %v1056_v51, %v1788_v3  ;;  %v1130_v22 = vmul.f32 %v1878_v54, %v1878_v54 }
  0xed   :  { %626 = vst [vmem:[%s2240_s3 + $0xd8] sm:$0xff] %v1880_v55 }
  0xee   :  { %v1058_v52 = vadd.f32 %v1057_v42, %v1822_v15  ;;  %v482_v8 = vpop.f32.mrf.mxu2 }
  0xef   :  { %v405_v56 = vpop.f32.mrf.mxu0  ;;  %v445_v57 = vpop.f32.mrf.mxu1 }
  0xf0   :  { %v406_v59 = vadd.f32 %v1630_v34, %v405_v56  ;;  %v446_v60 = vadd.f32 %v1630_v34, %v445_v57  ;;  %v1128_v56 = vmul.f32 %v1822_v15, %v1822_v15  ;;  %v1190_v57 = vadd.f32 %v1189_v31, %v1127_v23 }
  0xf1   :  { %v483_v15 = vadd.f32 %v1630_v34, %v482_v8 }
  0xf2   :  { %v547_v10 = vmax.f32 %v406_v59, 0.0  ;;  %v1896_v11 = vmax.f32 %v446_v60, 0.0  ;;  %v1129_v59 = vmul.f32 %v1844_v36, %v1844_v36  ;;  %v1191_v19 = vadd.f32 %v1190_v57, %v1128_v56 }
  0xf3   :  { %v1977_v50 = vmax.f32 %v483_v15, 0.0 }
  0xf4   :  { %611 = vst [vmem:[%s2240_s3 + $0x60] sm:$0xff] %v547_v10  ;;  %v1192_v32 = vadd.f32 %v1191_v19, %v1129_v59  ;;  %v1131_v45 = vmul.f32 %v547_v10, %v547_v10  ;;  %v1135_v19 = vmul.f32 %v1634_v40, %v1634_v40 }
  0xf5   :  { %627 = vst [vmem:[%s2240_s3 + $0xe0] sm:$0xff] %v1896_v11 }
  0xf6   :  { %v1193_v51 = vadd.f32 %v1192_v32, %v1130_v22  ;;  %642 = vst [vmem:[%s2240_s3 + $0x158] sm:$0xff] %v1977_v50 }
  0xf7   :  { %v407_v24 = vpop.f32.mrf.mxu0  ;;  %v447_v29 = vpop.f32.mrf.mxu1 }
  0xf8   :  { %v408_v25 = vadd.f32 %v1630_v34, %v407_v24  ;;  %v448_v28 = vadd.f32 %v1630_v34, %v447_v29  ;;  %v513_v24 = vadd.f32 %v1630_v34, %v512_v9  ;;  %v1059_v29 = vadd.f32 %v1058_v52, %v1844_v36 }
  0xfa   :  { %v548_v47 = vmax.f32 %v408_v25, 0.0  ;;  %v1940_v49 = vmax.f32 %v448_v28, 0.0  ;;  %v1060_v46 = vadd.f32 %v1059_v29, %v1878_v54  ;;  %v1983_v36 = vmax.f32 %v513_v24, 0.0 }
  0xfb   :  { %v1194_v54 = vadd.f32 %v1193_v51, %v1131_v45  ;;  %v1136_v24 = vmul.f32 %v1653_v48, %v1653_v48 }
  0xfc   :  { %612 = vst [vmem:[%s2240_s3 + $0x68] sm:$0xff] %v548_v47  ;;  %v1061_v23 = vadd.f32 %v1060_v46, %v547_v10  ;;  %v1132_v31 = vmul.f32 %v548_v47, %v548_v47 }
  0xfd   :  { %628 = vst [vmem:[%s2240_s3 + $0xe8] sm:$0xff] %v1940_v49 }
  0xfe   :  { %v1062_v57 = vadd.f32 %v1061_v23, %v548_v47  ;;  %654 = vst [vmem:[%s2240_s3 + $0x1b8] sm:$0xff] %v1983_v36  ;;  %v1137_v23 = vmul.f32 %v1664_v58, %v1664_v58 }
  0xff   :  { %v410_v60 = vpop.f32.mrf.mxu0  ;;  %v450_v63 = vpop.f32.mrf.mxu1 }
 0x100   :  { %v411_v0 = vadd.f32 %v1630_v34, %v410_v60  ;;  %v451_v3 = vadd.f32 %v1630_v34, %v450_v63  ;;  %v485_v60 = vpop.f32.mrf.mxu2  ;;  %v515_v63 = vpop.f32.mrf.mxu3 }
 0x101   :  { %v486_v32 = vadd.f32 %v1630_v34, %v485_v60  ;;  %v516_v45 = vadd.f32 %v1630_v34, %v515_v63 }
 0x102   :  { %v549_v25 = vmax.f32 %v411_v0, 0.0  ;;  %v1967_v28 = vmax.f32 %v451_v3, 0.0  ;;  %v1195_v0 = vadd.f32 %v1194_v54, %v1132_v31 }
 0x104   :  { %613 = vst [vmem:[%s2240_s3 + $0x70] sm:$0xff] %v549_v25  ;;  %v1133_v52 = vmul.f32 %v549_v25, %v549_v25  ;;  %v1063_v3 = vadd.f32 %v1062_v57, %v549_v25 }
 0x105   :  { %629 = vst [vmem:[%s2240_s3 + $0xf0] sm:$0xff] %v1967_v28 }
 0x106   :  { %v1196_v2 = vadd.f32 %v1195_v0, %v1133_v52 }
 0x107   :  { %v412_v42 = vpop.f32.mrf.mxu0  ;;  %v452_v56 = vpop.f32.mrf.mxu1 }
 0x108   :  { %v413_v59 = vadd.f32 %v1630_v34, %v412_v42  ;;  %v453_v10 = vadd.f32 %v1630_v34, %v452_v56  ;;  %v487_v46 = vpop.f32.mrf.mxu2  ;;  %v517_v51 = vpop.f32.mrf.mxu3  ;;  %v2025_v56 = vmax.f32 %v486_v32, 0.0  ;;  %v1144_v32 = vmul.f32 %v1824_v16, %v1824_v16 }
 0x109   :  { %v488_v31 = vadd.f32 %v1630_v34, %v487_v46 }
 0x10a   :  { %v550_v47 = vmax.f32 %v413_v59, 0.0  ;;  %v2003_v1 = vmax.f32 %v453_v10, 0.0  ;;  %v1138_v59 = vmul.f32 %v1679_v5, %v1679_v5  ;;  %643 = vst [vmem:[%s2240_s3 + $0x160] sm:$0xff] %v2025_v56 }
 0x10b   :  { %v2029_v57 = vmax.f32 %v488_v31, 0.0 }
 0x10c   :  { %614 = vst [vmem:[%s2240_s3 + $0x78] sm:$0xff] %v550_v47  ;;  %v1064_v8 = vadd.f32 %v1063_v3, %v550_v47  ;;  %v1134_v9 = vmul.f32 %v550_v47, %v550_v47 }
 0x10d   :  { %630 = vst [vmem:[%s2240_s3 + $0xf8] sm:$0xff] %v2003_v1 }
 0x10e   :  { %v1065_v22 = vadd.f32 %v1064_v8, %v1634_v40  ;;  %v1197_v15 = vadd.f32 %v1196_v2, %v1134_v9  ;;  %v518_v40 = vadd.f32 %v1630_v34, %v517_v51  ;;  %644 = vst [vmem:[%s2240_s3 + $0x168] sm:$0xff] %v2029_v57 }
 0x110   :  { %v1066_v29 = vadd.f32 %v1065_v22, %v1653_v48  ;;  %v1198_v25 = vadd.f32 %v1197_v15, %v1135_v19  ;;  %v2027_v48 = vmax.f32 %v516_v45, 0.0  ;;  %v2031_v52 = vmax.f32 %v518_v40, 0.0  ;;  %v490_v2 = vpop.f32.mrf.mxu2  ;;  %v520_v8 = vpop.f32.mrf.mxu3 }
 0x111   :  { %v1142_v22 = vmul.f32 %v1768_v53, %v1768_v53  ;;  %v521_v51 = vadd.f32 %v1630_v34, %v520_v8 }
 0x112   :  { %v1067_v54 = vadd.f32 %v1066_v29, %v1664_v58  ;;  %v1199_v42 = vadd.f32 %v1198_v25, %v1136_v24  ;;  %655 = vst [vmem:[%s2240_s3 + $0x1c0] sm:$0xff] %v2027_v48  ;;  %v1139_v58 = vmul.f32 %v1694_v18, %v1694_v18  ;;  %v1143_v29 = vmul.f32 %v1790_v4, %v1790_v4 }
 0x113   :  { %656 = vst [vmem:[%s2240_s3 + $0x1c8] sm:$0xff] %v2031_v52 }
 0x114   :  { %v1068_v10 = vadd.f32 %v1067_v54, %v1679_v5  ;;  %v1200_v60 = vadd.f32 %v1199_v42, %v1137_v23  ;;  %v1140_v5 = vmul.f32 %v1723_v30, %v1723_v30 }
 0x116   :  { %v1069_v63 = vadd.f32 %v1068_v10, %v1694_v18  ;;  %v1201_v0 = vadd.f32 %v1200_v60, %v1138_v59  ;;  %v1141_v18 = vmul.f32 %v1744_v43, %v1744_v43 }
 0x118   :  { %v1070_v3 = vadd.f32 %v1069_v63, %v1723_v30  ;;  %v1202_v47 = vadd.f32 %v1201_v0, %v1139_v58  ;;  %v492_v23 = vpop.f32.mrf.mxu2  ;;  %v522_v31 = vpop.f32.mrf.mxu3  ;;  %v1146_v58 = vmul.f32 %v1880_v55, %v1880_v55 }
 0x119   :  { %v493_v40 = vadd.f32 %v1630_v34, %v492_v23 }
 0x11a   :  { %v1203_v9 = vadd.f32 %v1202_v47, %v1140_v5  ;;  %v1071_v19 = vadd.f32 %v1070_v3, %v1744_v43  ;;  %v491_v43 = vadd.f32 %v1630_v34, %v490_v2  ;;  %v1147_v5 = vmul.f32 %v1896_v11, %v1896_v11 }
 0x11b   :  { %v2081_v10 = vmax.f32 %v493_v40, 0.0  ;;  %v1148_v2 = vmul.f32 %v1940_v49, %v1940_v49 }
 0x11c   :  { %v1072_v15 = vadd.f32 %v1071_v19, %v1768_v53  ;;  %v1204_v24 = vadd.f32 %v1203_v9, %v1141_v18  ;;  %v1145_v53 = vmul.f32 %v1846_v37, %v1846_v37  ;;  %v2077_v59 = vmax.f32 %v491_v43, 0.0 }
 0x11d   :  { %646 = vst [vmem:[%s2240_s3 + $0x178] sm:$0xff] %v2081_v10  ;;  %v1149_v9 = vmul.f32 %v1967_v28, %v1967_v28 }
 0x11e   :  { %v1073_v30 = vadd.f32 %v1072_v15, %v1790_v4  ;;  %v1205_v25 = vadd.f32 %v1204_v24, %v1142_v22  ;;  %v523_v4 = vadd.f32 %v1630_v34, %v522_v31  ;;  %645 = vst [vmem:[%s2240_s3 + $0x170] sm:$0xff] %v2077_v59  ;;  %v1150_v15 = vmul.f32 %v2003_v1, %v2003_v1 }
 0x11f   :  { %v1151_v24 = vmul.f32 %v1691_v14, %v1691_v14  ;;  %v1154_v31 = vmul.f32 %v1750_v44, %v1750_v44 }
 0x120   :  { %v1074_v45 = vadd.f32 %v1073_v30, %v1824_v16  ;;  %v1206_v46 = vadd.f32 %v1205_v25, %v1143_v29  ;;  %v2079_v16 = vmax.f32 %v521_v51, 0.0  ;;  %v2083_v60 = vmax.f32 %v523_v4, 0.0  ;;  %v525_v8 = vpop.f32.mrf.mxu3 }
 0x122   :  { %v1075_v54 = vadd.f32 %v1074_v45, %v1846_v37  ;;  %v1207_v42 = vadd.f32 %v1206_v46, %v1144_v32  ;;  %657 = vst [vmem:[%s2240_s3 + $0x1d0] sm:$0xff] %v2079_v16 }
 0x123   :  { %658 = vst [vmem:[%s2240_s3 + $0x1d8] sm:$0xff] %v2083_v60 }
 0x124   :  { %v1076_v63 = vadd.f32 %v1075_v54, %v1880_v55  ;;  %v1208_v0 = vadd.f32 %v1207_v42, %v1145_v53 }
 0x126   :  { %v1077_v37 = vadd.f32 %v1076_v63, %v1896_v11  ;;  %v1209_v3 = vadd.f32 %v1208_v0, %v1146_v58  ;;  %v1157_v63 = vmul.f32 %v1838_v26, %v1838_v26 }
 0x128   :  { %v1210_v55 = vadd.f32 %v1209_v3, %v1147_v5  ;;  %v1078_v47 = vadd.f32 %v1077_v37, %v1940_v49  ;;  %v1152_v49 = vmul.f32 %v1703_v20, %v1703_v20  ;;  %v527_v45 = vpop.f32.mrf.mxu3  ;;  %v1158_v5 = vmul.f32 %v1856_v39, %v1856_v39 }
 0x129   :  { %v528_v46 = vadd.f32 %v1630_v34, %v527_v45  ;;  %v1165_v45 = vmul.f32 %v2077_v59, %v2077_v59 }
 0x12a   :  { %v1211_v18 = vadd.f32 %v1210_v55, %v1148_v2  ;;  %v1079_v11 = vadd.f32 %v1078_v47, %v1967_v28  ;;  %v526_v28 = vadd.f32 %v1630_v34, %v525_v8  ;;  %v1159_v55 = vmul.f32 %v1898_v12, %v1898_v12 }
 0x12c   :  { %v1212_v19 = vadd.f32 %v1211_v18, %v1149_v9  ;;  %v1080_v22 = vadd.f32 %v1079_v11, %v2003_v1  ;;  %v1153_v1 = vmul.f32 %v1739_v38, %v1739_v38  ;;  %v2127_v23 = vmax.f32 %v526_v28, 0.0 }
 0x12e   :  { %v1081_v29 = vadd.f32 %v1080_v22, %v1691_v14  ;;  %v1213_v30 = vadd.f32 %v1212_v19, %v1150_v15  ;;  %v2129_v14 = vmax.f32 %v528_v46, 0.0  ;;  %659 = vst [vmem:[%s2240_s3 + $0x1e0] sm:$0xff] %v2127_v23 }
 0x130   :  { %v1082_v25 = vadd.f32 %v1081_v29, %v1703_v20  ;;  %v1214_v32 = vadd.f32 %v1213_v30, %v1151_v24  ;;  %660 = vst [vmem:[%s2240_s3 + $0x1e8] sm:$0xff] %v2129_v14  ;;  %v530_v58 = vpop.f32.mrf.mxu3  ;;  %v1163_v30 = vmul.f32 %v2025_v56, %v2025_v56 }
 0x132   :  { %v1083_v43 = vadd.f32 %v1082_v25, %v1739_v38  ;;  %v1215_v51 = vadd.f32 %v1214_v32, %v1152_v49  ;;  %v1155_v38 = vmul.f32 %v1782_v61, %v1782_v61 }
 0x134   :  { %v1084_v20 = vadd.f32 %v1083_v43, %v1750_v44  ;;  %v1216_v53 = vadd.f32 %v1215_v51, %v1153_v1  ;;  %v1156_v44 = vmul.f32 %v1800_v6, %v1800_v6  ;;  %v1166_v43 = vmul.f32 %v2081_v10, %v2081_v10 }
 0x136   :  { %v1085_v40 = vadd.f32 %v1084_v20, %v1782_v61  ;;  %v1217_v4 = vadd.f32 %v1216_v53, %v1154_v31 }
 0x138   :  { %v1218_v54 = vadd.f32 %v1217_v4, %v1155_v38  ;;  %v1086_v42 = vadd.f32 %v1085_v40, %v1800_v6  ;;  %v1160_v6 = vmul.f32 %v1905_v17, %v1905_v17  ;;  %v532_v11 = vpop.f32.mrf.mxu3 }
 0x139   :  { %v533_v9 = vadd.f32 %v1630_v34, %v532_v11 }
 0x13a   :  { %v1087_v0 = vadd.f32 %v1086_v42, %v1838_v26  ;;  %v1219_v37 = vadd.f32 %v1218_v54, %v1156_v44  ;;  %v531_v26 = vadd.f32 %v1630_v34, %v530_v58 }
 0x13c   :  { %v1088_v3 = vadd.f32 %v1087_v0, %v1856_v39  ;;  %v1220_v61 = vadd.f32 %v1219_v37, %v1157_v63  ;;  %v1161_v39 = vmul.f32 %v1969_v35, %v1969_v35  ;;  %v597_v15 = vmax.f32 %v531_v26, 0.0 }
 0x13e   :  { %v1089_v47 = vadd.f32 %v1088_v3, %v1898_v12  ;;  %v1221_v2 = vadd.f32 %v1220_v61, %v1158_v5  ;;  %v2165_v12 = vmax.f32 %v533_v9, 0.0  ;;  %661 = vst [vmem:[%s2240_s3 + $0x1f0] sm:$0xff] %v597_v15  ;;  %v1179_v9 = vmul.f32 %v2127_v23, %v2127_v23 }
 0x140   :  { %v1090_v8 = vadd.f32 %v1089_v47, %v1905_v17  ;;  %v1222_v18 = vadd.f32 %v1221_v2, %v1159_v55  ;;  %v1162_v17 = vmul.f32 %v1977_v50, %v1977_v50  ;;  %662 = vst [vmem:[%s2240_s3 + $0x1f8] sm:$0xff] %v2165_v12 }
 0x142   :  { %v1091_v19 = vadd.f32 %v1090_v8, %v1969_v35  ;;  %v1223_v22 = vadd.f32 %v1222_v18, %v1160_v6  ;;  %v1178_v18 = vmul.f32 %v2083_v60, %v2083_v60 }
 0x144   :  { %v1092_v24 = vadd.f32 %v1091_v19, %v1977_v50  ;;  %v1224_v29 = vadd.f32 %v1223_v22, %v1161_v39  ;;  %v1164_v50 = vmul.f32 %v2029_v57, %v2029_v57  ;;  %v1180_v19 = vmul.f32 %v2129_v14, %v2129_v14 }
 0x146   :  { %v1225_v34 = vadd.f32 %v1224_v29, %v1162_v17  ;;  %v1093_v35 = vadd.f32 %v1092_v24, %v2025_v56  ;;  %v1167_v56 = vmul.f32 %v1784_v62, %v1784_v62  ;;  %v1181_v24 = vmul.f32 %v597_v15, %v597_v15 }
 0x148   :  { %v1226_v49 = vadd.f32 %v1225_v34, %v1163_v30  ;;  %v1094_v25 = vadd.f32 %v1093_v35, %v2029_v57  ;;  %v1168_v57 = vmul.f32 %v1802_v7, %v1802_v7 }
 0x14a   :  { %v1227_v32 = vadd.f32 %v1226_v49, %v1164_v50  ;;  %v1095_v28 = vadd.f32 %v1094_v25, %v2077_v59  ;;  %v1169_v59 = vmul.f32 %v1840_v27, %v1840_v27 }
 0x14c   :  { %v1228_v46 = vadd.f32 %v1227_v32, %v1165_v45  ;;  %v1096_v1 = vadd.f32 %v1095_v28, %v2081_v10  ;;  %v1170_v10 = vmul.f32 %v1858_v41, %v1858_v41 }
 0x14e   :  { %v1097_v51 = vadd.f32 %v1096_v1, %v1784_v62  ;;  %v1229_v31 = vadd.f32 %v1228_v46, %v1166_v43  ;;  %v1171_v62 = vmul.f32 %v1900_v13, %v1900_v13 }
 0x150   :  { %v1098_v20 = vadd.f32 %v1097_v51, %v1802_v7  ;;  %v1230_v53 = vadd.f32 %v1229_v31, %v1167_v56  ;;  %v1172_v7 = vmul.f32 %v1913_v21, %v1913_v21 }
 0x152   :  { %v1099_v38 = vadd.f32 %v1098_v20, %v1840_v27  ;;  %v1231_v40 = vadd.f32 %v1230_v53, %v1168_v57  ;;  %v1173_v27 = vmul.f32 %v1971_v33, %v1971_v33 }
 0x154   :  { %v1100_v4 = vadd.f32 %v1099_v38, %v1858_v41  ;;  %v1232_v44 = vadd.f32 %v1231_v40, %v1169_v59  ;;  %v1174_v41 = vmul.f32 %v1983_v36, %v1983_v36 }
 0x156   :  { %v1101_v54 = vadd.f32 %v1100_v4, %v1900_v13  ;;  %v1233_v42 = vadd.f32 %v1232_v44, %v1170_v10  ;;  %v1175_v13 = vmul.f32 %v2027_v48, %v2027_v48 }
 0x158   :  { %v1234_v58 = vadd.f32 %v1233_v42, %v1171_v62  ;;  %v1102_v63 = vadd.f32 %v1101_v54, %v1913_v21  ;;  %v1176_v21 = vmul.f32 %v2031_v52, %v2031_v52 }
 0x15a   :  { %v1103_v0 = vadd.f32 %v1102_v63, %v1971_v33  ;;  %v1235_v37 = vadd.f32 %v1234_v58, %v1172_v7  ;;  %v1177_v33 = vmul.f32 %v2079_v16, %v2079_v16 }
 0x15c   :  { %v1104_v5 = vadd.f32 %v1103_v0, %v1983_v36  ;;  %v1236_v3 = vadd.f32 %v1235_v37, %v1173_v27 }
 0x15e   :  { %v1105_v61 = vadd.f32 %v1104_v5, %v2027_v48  ;;  %v1237_v55 = vadd.f32 %v1236_v3, %v1174_v41 }
 0x160   :  { %v1106_v47 = vadd.f32 %v1105_v61, %v2031_v52  ;;  %v1238_v2 = vadd.f32 %v1237_v55, %v1175_v13 }
 0x162   :  { %v1107_v6 = vadd.f32 %v1106_v47, %v2079_v16  ;;  %v1239_v8 = vadd.f32 %v1238_v2, %v1176_v21 }
 0x164   :  { %v1108_v36 = vadd.f32 %v1107_v6, %v2083_v60  ;;  %v1240_v26 = vadd.f32 %v1239_v8, %v1177_v33  ;;  %v1182_v60 = vmul.f32 %v2165_v12, %v2165_v12 }
 0x166   :  { %v1241_v48 = vadd.f32 %v1240_v26, %v1178_v18  ;;  %v1109_v11 = vadd.f32 %v1108_v36, %v2127_v23  ;;  %v664_v23 = vlaneseq }
 0x168   :  { %v1242_v52 = vadd.f32 %v1241_v48, %v1179_v9  ;;  %v1110_v39 = vadd.f32 %v1109_v11, %v2129_v14  ;;  %v665_v45 = vshrl.u32 %v664_v23, 7 }
 0x16a   :  { %v1243_v16 = vadd.f32 %v1242_v52, %v1180_v19  ;;  %v1111_v22 = vadd.f32 %v1110_v39, %v597_v15  ;;  %vm1253_vm2 = vcmp.eq.s32.totalorder %v665_v45, 1  ;;  %vm1252_vm3 = vcmp.eq.s32.totalorder %v665_v45, 0 }
 0x16c   :  { %v1244_v17 = vadd.f32 %v1243_v16, %v1181_v24  ;;  %v1112_v29 = vadd.f32 %v1111_v22, %v2165_v12 }
 0x16e   :  { %v1113_v34 = vrot.slane %v1112_v29, 4  ;;  %v1245_v35 = vadd.f32 %v1244_v17, %v1182_v60 }
 0x170   :  { %v1114_v30 = vadd.f32 %v1113_v34, %v1112_v29  ;;  %v1246_v49 = vrot.slane %v1245_v35, 4 }
 0x172   :  { %v1115_v25 = vrot.slane %v1114_v30, 2  ;;  %v1247_v50 = vadd.f32 %v1246_v49, %v1245_v35 }
 0x174   :  { %v1116_v32 = vadd.f32 %v1115_v25, %v1114_v30  ;;  %v1248_v28 = vrot.slane %v1247_v50, 2 }
 0x176   :  { %v1249_v14 = vadd.f32 %v1248_v28, %v1247_v50  ;;  %v1117_v46 = vrot.slane %v1116_v32, 1 }
 0x178   :  { %v1250_v1 = vrot.slane %v1249_v14, 1  ;;  %v1118_v43 = vadd.f32 %v1117_v46, %v1116_v32 }
 0x17a   :  { %v1251_v15 = vadd.f32 %v1250_v1, %v1249_v14 }
 0x17c   :  { %v1256_v56 = vsel %vm1253_vm2, %v1251_v15, 0.0 }
 0x17d   :  { %v1259_v51 = vsel %vm1252_vm3, %v1118_v43, %v1256_v56 }
 0x17e   :  { %1260 = vst [vmem:[%s2241_s4] sm:$0xff] %v1259_v51 }

// kernel: unet_conv_block.3
= control target key start
LH: loop header
LB: loop body
LE: loop exit
PB: predicated region body
PF: predicated region fallthrough
CT: control target
= control target key end

     0   :  { %vm378_vm0 = vcmask 1043456   ;;  %vm281_vm1 = vcmask 588800   ;;  %s2275_s1 = inlined_call_operand.vmem [shape: bf16[72,128], index: 1, kind: input, shape index: {}]   ;;  %s2276_s2 = inlined_call_operand.vmem [shape: f32[1,128], index: 2, kind: input, shape index: {}]   ;;  %s2277_s0 = inlined_call_operand.vmem [shape: bf16[512,72], index: 0, kind: input, shape index: {}]   ;;  %s2278_s3 = inlined_call_operand.vmem [shape: f32[512,128], index: 3, kind: output, shape index: {0}]   ;;  %s2279_s4 = inlined_call_operand.vmem [shape: f32[8,128], index: 4, kind: output, shape index: {1}]  }
   0x1   :  { %v89_v0 = vld [vmem:[%s2275_s1 + $0x20] sm:$0xf]  ;;  %v1496_v4 = vld [vmem:[%s2275_s1 + $0x18] sm:$0xff]  ;;  %v1495_v5 = vld [vmem:[%s2275_s1 + $0x10] sm:$0xff] }
   0x2   :  { %v271_v1 = vunpack.c.l.b16 %v89_v0  ;;  %v1494_v6 = vld [vmem:[%s2275_s1 + $0x8] sm:$0xff]  ;;  %v1493_v7 = vld [vmem:[%s2275_s1] sm:$0xff]  ;;  %v1463_v13 = vld [vmem:[%s2277_s0 + $0x10] sm:$0xff] }
   0x3   :  { %v1461_v8 = vld [vmem:[%s2277_s0] sm:$0xff]  ;;  %v1462_v10 = vld [vmem:[%s2277_s0 + $0x8] sm:$0xff]  ;;  %v1471_v14 = vld [vmem:[%s2277_s0 + $0x50] sm:$0xff] }
   0x4   :  { %v276_v2 = vpack.c.b16 %v271_v1, %v271_v1  ;;  %v1469_v9 = vld [vmem:[%s2277_s0 + $0x40] sm:$0xff]  ;;  %v1470_v11 = vld [vmem:[%s2277_s0 + $0x48] sm:$0xff]  ;;  %v1464_v16 = vld [vmem:[%s2277_s0 + $0x18] sm:$0xff] }
   0x5   :  { %v1477_v12 = vld [vmem:[%s2277_s0 + $0x80] sm:$0xff]  ;;  %v1478_v15 = vld [vmem:[%s2277_s0 + $0x88] sm:$0xff]  ;;  %v1472_v17 = vld [vmem:[%s2277_s0 + $0x58] sm:$0xff] }
   0x6   :  { %v380_v3 = vsel %vm378_vm0, %v276_v2, 0  ;;  %v1479_v18 = vld [vmem:[%s2277_s0 + $0x90] sm:$0xff]  ;;  %v1485_v19 = vld [vmem:[%s2277_s0 + $0xc0] sm:$0xff]  ;;  %v1480_v22 = vld [vmem:[%s2277_s0 + $0x98] sm:$0xff] }
   0x7   :  { %385 = vmatpush.bf16.msra.mxu0 %v380_v3  ;;  %1497 = vmatpush.bf16.msra.mxu1 %v380_v3  ;;  %v1465_v20 = vld [vmem:[%s2277_s0 + $0x20] sm:$0xff]  ;;  %v1486_v23 = vld [vmem:[%s2277_s0 + $0xc8] sm:$0xff]  ;;  %v1487_v27 = vld [vmem:[%s2277_s0 + $0xd0] sm:$0xff] }
   0x8   :  { %1498 = vmatpush.bf16.msra.mxu2 %v380_v3  ;;  %1499 = vmatpush.bf16.msra.mxu3 %v380_v3  ;;  %v1473_v21 = vld [vmem:[%s2277_s0 + $0x60] sm:$0xff]  ;;  %v1466_v24 = vld [vmem:[%s2277_s0 + $0x28] sm:$0xff]  ;;  %v1467_v28 = vld [vmem:[%s2277_s0 + $0x30] sm:$0xff] }
   0x9   :  { %v1474_v25 = vld [vmem:[%s2277_s0 + $0x68] sm:$0xff]  ;;  %v1481_v26 = vld [vmem:[%s2277_s0 + $0xa0] sm:$0xff]  ;;  %v1475_v29 = vld [vmem:[%s2277_s0 + $0x70] sm:$0xff] }
   0xa   :  { %v1482_v30 = vld [vmem:[%s2277_s0 + $0xa8] sm:$0xff]  ;;  %v1488_v31 = vld [vmem:[%s2277_s0 + $0xd8] sm:$0xff]  ;;  %v1483_v34 = vld [vmem:[%s2277_s0 + $0xb0] sm:$0xff] }
   0xb   :  { %386 = vmatpush.bf16.msra.mxu0 %v1496_v4  ;;  %1500 = vmatpush.bf16.msra.mxu1 %v1496_v4  ;;  %v1468_v32 = vld [vmem:[%s2277_s0 + $0x38] sm:$0xff]  ;;  %v1489_v35 = vld [vmem:[%s2277_s0 + $0xe0] sm:$0xff]  ;;  %v1490_v44 = vld [vmem:[%s2277_s0 + $0xe8] sm:$0xff] }
   0xc   :  { %1501 = vmatpush.bf16.msra.mxu2 %v1496_v4  ;;  %1502 = vmatpush.bf16.msra.mxu3 %v1496_v4  ;;  %v1476_v33 = vld [vmem:[%s2277_s0 + $0x78] sm:$0xff]  ;;  %v1668_v36 = vld [vmem:[%s2276_s2] ss:$0 sm:$0xff]  ;;  %v1491_v61 = vld [vmem:[%s2277_s0 + $0xf0] sm:$0xff] }
   0xd   :  { %v1484_v43 = vld [vmem:[%s2277_s0 + $0xb8] sm:$0xff] }
   0xf   :  { %387 = vmatpush.bf16.msra.mxu0 %v1495_v5  ;;  %1503 = vmatpush.bf16.msra.mxu1 %v1495_v5 }
  0x10   :  { %1504 = vmatpush.bf16.msra.mxu2 %v1495_v5  ;;  %1505 = vmatpush.bf16.msra.mxu3 %v1495_v5 }
  0x13   :  { %388 = vmatpush.bf16.msra.mxu0 %v1494_v6  ;;  %1506 = vmatpush.bf16.msra.mxu1 %v1494_v6 }
  0x14   :  { %1507 = vmatpush.bf16.msra.mxu2 %v1494_v6  ;;  %1508 = vmatpush.bf16.msra.mxu3 %v1494_v6 }
  0x17   :  { %389 = vmatpush.bf16.msra.mxu0 %v1493_v7  ;;  %1509 = vmatpush.bf16.msra.mxu1 %v1493_v7 }
  0x18   :  { %1510 = vmatpush.bf16.msra.mxu2 %v1493_v7  ;;  %1511 = vmatpush.bf16.msra.mxu3 %v1493_v7 }
  0x1a   :  { %1429 = vmatmul.msk.bf16.vlgmr.msra.gmra.mxu0 %vm281_vm1, %v1461_v8  ;;  %1437 = vmatmul.msk.bf16.vlgmr.msra.gmra.mxu1 %vm281_vm1, %v1469_v9 }
  0x1b   :  { %1445 = vmatmul.msk.bf16.vlgmr.msra.gmra.mxu2 %vm281_vm1, %v1477_v12  ;;  %1453 = vmatmul.msk.bf16.vlgmr.msra.gmra.mxu3 %vm281_vm1, %v1485_v19 }
  0x2a   :  { %1430 = vmatmul.msk.bf16.gmra.mxu0 %vm281_vm1, %v1462_v10  ;;  %1438 = vmatmul.msk.bf16.gmra.mxu1 %vm281_vm1, %v1470_v11 }
  0x2b   :  { %1446 = vmatmul.msk.bf16.gmra.mxu2 %vm281_vm1, %v1478_v15  ;;  %1454 = vmatmul.msk.bf16.gmra.mxu3 %vm281_vm1, %v1486_v23 }
  0x3a   :  { %1431 = vmatmul.msk.bf16.gmra.mxu0 %vm281_vm1, %v1463_v13  ;;  %1439 = vmatmul.msk.bf16.gmra.mxu1 %vm281_vm1, %v1471_v14 }
  0x3b   :  { %1447 = vmatmul.msk.bf16.gmra.mxu2 %vm281_vm1, %v1479_v18  ;;  %1455 = vmatmul.msk.bf16.gmra.mxu3 %vm281_vm1, %v1487_v27 }
  0x4a   :  { %1432 = vmatmul.msk.bf16.gmra.mxu0 %vm281_vm1, %v1464_v16  ;;  %1440 = vmatmul.msk.bf16.gmra.mxu1 %vm281_vm1, %v1472_v17 }
  0x4b   :  { %1448 = vmatmul.msk.bf16.gmra.mxu2 %vm281_vm1, %v1480_v22  ;;  %1456 = vmatmul.msk.bf16.gmra.mxu3 %vm281_vm1, %v1488_v31 }
  0x5a   :  { %1433 = vmatmul.msk.bf16.gmra.mxu0 %vm281_vm1, %v1465_v20  ;;  %1441 = vmatmul.msk.bf16.gmra.mxu1 %vm281_vm1, %v1473_v21  ;;  %v1492_v21 = vld [vmem:[%s2277_s0 + $0xf8] sm:$0xff] }
  0x5b   :  { %1449 = vmatmul.msk.bf16.gmra.mxu2 %vm281_vm1, %v1481_v26  ;;  %1457 = vmatmul.msk.bf16.gmra.mxu3 %vm281_vm1, %v1489_v35 }
  0x6a   :  { %1434 = vmatmul.msk.bf16.gmra.mxu0 %vm281_vm1, %v1466_v24  ;;  %1442 = vmatmul.msk.bf16.gmra.mxu1 %vm281_vm1, %v1474_v25 }
  0x6b   :  { %1450 = vmatmul.msk.bf16.gmra.mxu2 %vm281_vm1, %v1482_v30  ;;  %1458 = vmatmul.msk.bf16.gmra.mxu3 %vm281_vm1, %v1490_v44 }
  0x7a   :  { %1435 = vmatmul.msk.bf16.gmra.mxu0 %vm281_vm1, %v1467_v28  ;;  %1443 = vmatmul.msk.bf16.gmra.mxu1 %vm281_vm1, %v1475_v29 }
  0x7b   :  { %1451 = vmatmul.msk.bf16.gmra.mxu2 %vm281_vm1, %v1483_v34  ;;  %1459 = vmatmul.msk.bf16.gmra.mxu3 %vm281_vm1, %v1491_v61 }
  0x8a   :  { %1436 = vmatmul.msk.bf16.gmra.mxu0 %vm281_vm1, %v1468_v32  ;;  %1444 = vmatmul.msk.bf16.gmra.mxu1 %vm281_vm1, %v1476_v33 }
  0x8b   :  { %1452 = vmatmul.msk.bf16.gmra.mxu2 %vm281_vm1, %v1484_v43  ;;  %1460 = vmatmul.msk.bf16.gmra.mxu3 %vm281_vm1, %v1492_v21 }
  0x97   :  { %v391_v37 = vpop.f32.mrf.mxu0  ;;  %v431_v38 = vpop.f32.mrf.mxu1 }
  0x98   :  { %v392_v39 = vadd.f32 %v1668_v36, %v391_v37  ;;  %v432_v40 = vadd.f32 %v1668_v36, %v431_v38 }
  0x9a   :  { %v551_v41 = vmax.f32 %v392_v39, 0.0  ;;  %v1672_v42 = vmax.f32 %v432_v40, 0.0 }
  0x9c   :  { %615 = vst [vmem:[%s2278_s3] sm:$0xff] %v551_v41  ;;  %v1135_v51 = vmul.f32 %v551_v41, %v551_v41 }
  0x9d   :  { %631 = vst [vmem:[%s2278_s3 + $0x80] sm:$0xff] %v1672_v42 }
  0x9e   :  { %v471_v5 = vpop.f32.mrf.mxu2 }
  0x9f   :  { %v393_v45 = vpop.f32.mrf.mxu0  ;;  %v433_v46 = vpop.f32.mrf.mxu1  ;;  %v472_v11 = vadd.f32 %v1668_v36, %v471_v5 }
  0xa0   :  { %v394_v47 = vadd.f32 %v1668_v36, %v393_v45  ;;  %v434_v48 = vadd.f32 %v1668_v36, %v433_v46 }
  0xa1   :  { %v1729_v16 = vmax.f32 %v472_v11, 0.0 }
  0xa2   :  { %v552_v49 = vmax.f32 %v394_v47, 0.0  ;;  %v1691_v50 = vmax.f32 %v434_v48, 0.0 }
  0xa3   :  { %647 = vst [vmem:[%s2278_s3 + $0x100] sm:$0xff] %v1729_v16 }
  0xa4   :  { %616 = vst [vmem:[%s2278_s3 + $0x8] sm:$0xff] %v552_v49  ;;  %v1066_v52 = vadd.f32 %v552_v49, %v551_v41  ;;  %v1136_v53 = vmul.f32 %v552_v49, %v552_v49 }
  0xa5   :  { %632 = vst [vmem:[%s2278_s3 + $0x88] sm:$0xff] %v1691_v50 }
  0xa6   :  { %v1199_v54 = vadd.f32 %v1136_v53, %v1135_v51  ;;  %v473_v17 = vpop.f32.mrf.mxu2  ;;  %v511_v53 = vpop.f32.mrf.mxu3 }
  0xa7   :  { %v396_v55 = vpop.f32.mrf.mxu0  ;;  %v436_v56 = vpop.f32.mrf.mxu1  ;;  %v474_v18 = vadd.f32 %v1668_v36, %v473_v17 }
  0xa8   :  { %v397_v57 = vadd.f32 %v1668_v36, %v396_v55  ;;  %v437_v58 = vadd.f32 %v1668_v36, %v436_v56 }
  0xa9   :  { %v1741_v22 = vmax.f32 %v474_v18, 0.0 }
  0xaa   :  { %v553_v59 = vmax.f32 %v397_v57, 0.0  ;;  %v1702_v60 = vmax.f32 %v437_v58, 0.0  ;;  %v512_v57 = vadd.f32 %v1668_v36, %v511_v53 }
  0xab   :  { %648 = vst [vmem:[%s2278_s3 + $0x108] sm:$0xff] %v1741_v22 }
  0xac   :  { %617 = vst [vmem:[%s2278_s3 + $0x10] sm:$0xff] %v553_v59  ;;  %v1067_v62 = vadd.f32 %v1066_v52, %v553_v59  ;;  %v1137_v63 = vmul.f32 %v553_v59, %v553_v59 }
  0xad   :  { %633 = vst [vmem:[%s2278_s3 + $0x90] sm:$0xff] %v1702_v60 }
  0xae   :  { %v1200_v0 = vadd.f32 %v1199_v54, %v1137_v63  ;;  %v476_v30 = vpop.f32.mrf.mxu2 }
  0xaf   :  { %v398_v1 = vpop.f32.mrf.mxu0  ;;  %v438_v2 = vpop.f32.mrf.mxu1  ;;  %v477_v34 = vadd.f32 %v1668_v36, %v476_v30 }
  0xb0   :  { %v399_v3 = vadd.f32 %v1668_v36, %v398_v1  ;;  %v439_v4 = vadd.f32 %v1668_v36, %v438_v2  ;;  %v513_v2 = vpop.f32.mrf.mxu3 }
  0xb1   :  { %v1777_v40 = vmax.f32 %v477_v34, 0.0 }
  0xb2   :  { %v554_v6 = vmax.f32 %v399_v3, 0.0  ;;  %v1717_v7 = vmax.f32 %v439_v4, 0.0  ;;  %v514_v4 = vadd.f32 %v1668_v36, %v513_v2 }
  0xb3   :  { %649 = vst [vmem:[%s2278_s3 + $0x110] sm:$0xff] %v1777_v40 }
  0xb4   :  { %618 = vst [vmem:[%s2278_s3 + $0x18] sm:$0xff] %v554_v6  ;;  %v1068_v8 = vadd.f32 %v1067_v62, %v554_v6  ;;  %v1138_v9 = vmul.f32 %v554_v6, %v554_v6 }
  0xb5   :  { %634 = vst [vmem:[%s2278_s3 + $0x98] sm:$0xff] %v1717_v7 }
  0xb6   :  { %v1201_v10 = vadd.f32 %v1200_v0, %v1138_v9  ;;  %v478_v41 = vpop.f32.mrf.mxu2  ;;  %v1822_v0 = vmax.f32 %v512_v57, 0.0  ;;  %v1840_v9 = vmax.f32 %v514_v4, 0.0 }
  0xb7   :  { %v401_v12 = vpop.f32.mrf.mxu0  ;;  %v441_v13 = vpop.f32.mrf.mxu1  ;;  %v479_v43 = vadd.f32 %v1668_v36, %v478_v41 }
  0xb8   :  { %v402_v14 = vadd.f32 %v1668_v36, %v401_v12  ;;  %v442_v15 = vadd.f32 %v1668_v36, %v441_v13  ;;  %663 = vst [vmem:[%s2278_s3 + $0x180] sm:$0xff] %v1822_v0 }
  0xb9   :  { %v1788_v46 = vmax.f32 %v479_v43, 0.0  ;;  %664 = vst [vmem:[%s2278_s3 + $0x188] sm:$0xff] %v1840_v9 }
  0xba   :  { %v555_v19 = vmax.f32 %v402_v14, 0.0  ;;  %v1732_v20 = vmax.f32 %v442_v15, 0.0  ;;  %v516_v15 = vpop.f32.mrf.mxu3 }
  0xbb   :  { %650 = vst [vmem:[%s2278_s3 + $0x118] sm:$0xff] %v1788_v46  ;;  %v517_v21 = vadd.f32 %v1668_v36, %v516_v15 }
  0xbc   :  { %619 = vst [vmem:[%s2278_s3 + $0x20] sm:$0xff] %v555_v19  ;;  %v1069_v23 = vadd.f32 %v1068_v8, %v555_v19  ;;  %v1139_v24 = vmul.f32 %v555_v19, %v555_v19 }
  0xbd   :  { %635 = vst [vmem:[%s2278_s3 + $0xa0] sm:$0xff] %v1732_v20 }
  0xbe   :  { %v1751_v25 = vadd.f32 %v1201_v10, %v1139_v24  ;;  %v481_v52 = vpop.f32.mrf.mxu2 }
  0xbf   :  { %v403_v26 = vpop.f32.mrf.mxu0  ;;  %v443_v27 = vpop.f32.mrf.mxu1  ;;  %v482_v56 = vadd.f32 %v1668_v36, %v481_v52 }
  0xc0   :  { %v404_v28 = vadd.f32 %v1668_v36, %v403_v26  ;;  %v444_v29 = vadd.f32 %v1668_v36, %v443_v27 }
  0xc1   :  { %v1820_v63 = vmax.f32 %v482_v56, 0.0 }
  0xc2   :  { %v1759_v31 = vmax.f32 %v404_v28, 0.0  ;;  %v1761_v32 = vmax.f32 %v444_v29, 0.0  ;;  %v1878_v29 = vmax.f32 %v517_v21, 0.0  ;;  %v518_v34 = vpop.f32.mrf.mxu3 }
  0xc3   :  { %651 = vst [vmem:[%s2278_s3 + $0x120] sm:$0xff] %v1820_v63 }
  0xc4   :  { %620 = vst [vmem:[%s2278_s3 + $0x28] sm:$0xff] %v1759_v31  ;;  %v1768_v33 = vadd.f32 %v1069_v23, %v1759_v31  ;;  %v1140_v21 = vmul.f32 %v1759_v31, %v1759_v31 }
  0xc5   :  { %636 = vst [vmem:[%s2278_s3 + $0xa8] sm:$0xff] %v1761_v32 }
  0xc6   :  { %v483_v1 = vpop.f32.mrf.mxu2  ;;  %665 = vst [vmem:[%s2278_s3 + $0x190] sm:$0xff] %v1878_v29 }
  0xc7   :  { %v406_v35 = vpop.f32.mrf.mxu0  ;;  %v446_v37 = vpop.f32.mrf.mxu1  ;;  %v484_v3 = vadd.f32 %v1668_v36, %v483_v1 }
  0xc8   :  { %v407_v38 = vadd.f32 %v1668_v36, %v406_v35  ;;  %v447_v39 = vadd.f32 %v1668_v36, %v446_v37  ;;  %v519_v37 = vadd.f32 %v1668_v36, %v518_v34 }
  0xc9   :  { %v1838_v8 = vmax.f32 %v484_v3, 0.0 }
  0xca   :  { %v1780_v44 = vmax.f32 %v407_v38, 0.0  ;;  %v1782_v45 = vmax.f32 %v447_v39, 0.0  ;;  %v1896_v43 = vmax.f32 %v519_v37, 0.0  ;;  %v521_v53 = vpop.f32.mrf.mxu3  ;;  %v1203_v37 = vadd.f32 %v1751_v25, %v1140_v21 }
  0xcb   :  { %652 = vst [vmem:[%s2278_s3 + $0x128] sm:$0xff] %v1838_v8  ;;  %v522_v2 = vadd.f32 %v1668_v36, %v521_v53 }
  0xcc   :  { %621 = vst [vmem:[%s2278_s3 + $0x30] sm:$0xff] %v1780_v44 }
  0xcd   :  { %637 = vst [vmem:[%s2278_s3 + $0xb0] sm:$0xff] %v1782_v45  ;;  %v1938_v15 = vmax.f32 %v522_v2, 0.0 }
  0xce   :  { %v486_v14 = vpop.f32.mrf.mxu2  ;;  %666 = vst [vmem:[%s2278_s3 + $0x198] sm:$0xff] %v1896_v43 }
  0xcf   :  { %v408_v47 = vpop.f32.mrf.mxu0  ;;  %v448_v48 = vpop.f32.mrf.mxu1  ;;  %v487_v19 = vadd.f32 %v1668_v36, %v486_v14  ;;  %667 = vst [vmem:[%s2278_s3 + $0x1a0] sm:$0xff] %v1938_v15 }
  0xd0   :  { %v409_v49 = vadd.f32 %v1668_v36, %v408_v47  ;;  %v449_v51 = vadd.f32 %v1668_v36, %v448_v48 }
  0xd1   :  { %v1876_v28 = vmax.f32 %v487_v19, 0.0 }
  0xd2   :  { %v1804_v54 = vmax.f32 %v409_v49, 0.0  ;;  %v1806_v55 = vmax.f32 %v449_v51, 0.0  ;;  %v523_v4 = vpop.f32.mrf.mxu3 }
  0xd3   :  { %653 = vst [vmem:[%s2278_s3 + $0x130] sm:$0xff] %v1876_v28 }
  0xd4   :  { %622 = vst [vmem:[%s2278_s3 + $0x38] sm:$0xff] %v1804_v54 }
  0xd5   :  { %638 = vst [vmem:[%s2278_s3 + $0xb8] sm:$0xff] %v1806_v55 }
  0xd6   :  { %v488_v30 = vpop.f32.mrf.mxu2 }
  0xd7   :  { %v411_v58 = vpop.f32.mrf.mxu0  ;;  %v451_v59 = vpop.f32.mrf.mxu1  ;;  %v489_v35 = vadd.f32 %v1668_v36, %v488_v30 }
  0xd8   :  { %v412_v61 = vadd.f32 %v1668_v36, %v411_v58  ;;  %v452_v62 = vadd.f32 %v1668_v36, %v451_v59 }
  0xd9   :  { %v1894_v41 = vmax.f32 %v489_v35, 0.0 }
  0xda   :  { %v1826_v5 = vmax.f32 %v412_v61, 0.0  ;;  %v1828_v6 = vmax.f32 %v452_v62, 0.0  ;;  %v526_v35 = vpop.f32.mrf.mxu3 }
  0xdb   :  { %654 = vst [vmem:[%s2278_s3 + $0x138] sm:$0xff] %v1894_v41 }
  0xdc   :  { %623 = vst [vmem:[%s2278_s3 + $0x40] sm:$0xff] %v1826_v5  ;;  %v1143_v25 = vmul.f32 %v1826_v5, %v1826_v5 }
  0xdd   :  { %639 = vst [vmem:[%s2278_s3 + $0xc0] sm:$0xff] %v1828_v6 }
  0xde   :  { %v491_v52 = vpop.f32.mrf.mxu2 }
  0xdf   :  { %v413_v10 = vpop.f32.mrf.mxu0  ;;  %v453_v11 = vpop.f32.mrf.mxu1  ;;  %v492_v1 = vadd.f32 %v1668_v36, %v491_v52 }
  0xe0   :  { %v414_v12 = vadd.f32 %v1668_v36, %v413_v10  ;;  %v454_v13 = vadd.f32 %v1668_v36, %v453_v11  ;;  %v524_v11 = vadd.f32 %v1668_v36, %v523_v4  ;;  %v527_v4 = vadd.f32 %v1668_v36, %v526_v35 }
  0xe1   :  { %v1936_v14 = vmax.f32 %v492_v1, 0.0 }
  0xe2   :  { %v1860_v17 = vmax.f32 %v414_v12, 0.0  ;;  %v1862_v18 = vmax.f32 %v454_v13, 0.0  ;;  %v2009_v35 = vmax.f32 %v527_v4, 0.0 }
  0xe3   :  { %655 = vst [vmem:[%s2278_s3 + $0x140] sm:$0xff] %v1936_v14 }
  0xe4   :  { %624 = vst [vmem:[%s2278_s3 + $0x48] sm:$0xff] %v1860_v17 }
  0xe5   :  { %640 = vst [vmem:[%s2278_s3 + $0xc8] sm:$0xff] %v1862_v18 }
  0xe6   :  { %v493_v3 = vpop.f32.mrf.mxu2  ;;  %669 = vst [vmem:[%s2278_s3 + $0x1b0] sm:$0xff] %v2009_v35 }
  0xe7   :  { %v416_v23 = vpop.f32.mrf.mxu0  ;;  %v456_v24 = vpop.f32.mrf.mxu1  ;;  %v494_v10 = vadd.f32 %v1668_v36, %v493_v3 }
  0xe8   :  { %v417_v26 = vadd.f32 %v1668_v36, %v416_v23  ;;  %v457_v27 = vadd.f32 %v1668_v36, %v456_v24  ;;  %v1951_v23 = vmax.f32 %v524_v11, 0.0  ;;  %v1141_v24 = vmul.f32 %v1780_v44, %v1780_v44  ;;  %v528_v11 = vpop.f32.mrf.mxu3 }
  0xe9   :  { %v1943_v19 = vmax.f32 %v494_v10, 0.0 }
  0xea   :  { %v1882_v38 = vmax.f32 %v417_v26, 0.0  ;;  %v1884_v39 = vmax.f32 %v457_v27, 0.0  ;;  %668 = vst [vmem:[%s2278_s3 + $0x1a8] sm:$0xff] %v1951_v23  ;;  %v1204_v52 = vadd.f32 %v1203_v37, %v1141_v24 }
  0xeb   :  { %656 = vst [vmem:[%s2278_s3 + $0x148] sm:$0xff] %v1943_v19 }
  0xec   :  { %625 = vst [vmem:[%s2278_s3 + $0x50] sm:$0xff] %v1882_v38 }
  0xed   :  { %641 = vst [vmem:[%s2278_s3 + $0xd0] sm:$0xff] %v1884_v39 }
  0xee   :  { %v496_v34 = vpop.f32.mrf.mxu2 }
  0xef   :  { %v418_v47 = vpop.f32.mrf.mxu0  ;;  %v458_v48 = vpop.f32.mrf.mxu1  ;;  %v497_v3 = vadd.f32 %v1668_v36, %v496_v34 }
  0xf0   :  { %v419_v49 = vadd.f32 %v1668_v36, %v418_v47  ;;  %v459_v51 = vadd.f32 %v1668_v36, %v458_v48  ;;  %v1071_v47 = vadd.f32 %v1768_v33, %v1780_v44  ;;  %v1142_v48 = vmul.f32 %v1804_v54, %v1804_v54 }
  0xf1   :  { %v2007_v37 = vmax.f32 %v497_v3, 0.0 }
  0xf2   :  { %v1916_v56 = vmax.f32 %v419_v49, 0.0  ;;  %v1918_v57 = vmax.f32 %v459_v51, 0.0  ;;  %v1072_v53 = vadd.f32 %v1071_v47, %v1804_v54  ;;  %v1205_v33 = vadd.f32 %v1204_v52, %v1142_v48 }
  0xf3   :  { %657 = vst [vmem:[%s2278_s3 + $0x150] sm:$0xff] %v2007_v37 }
  0xf4   :  { %626 = vst [vmem:[%s2278_s3 + $0x58] sm:$0xff] %v1916_v56  ;;  %v1073_v44 = vadd.f32 %v1072_v53, %v1826_v5  ;;  %v1146_v24 = vmul.f32 %v1916_v56, %v1916_v56 }
  0xf5   :  { %642 = vst [vmem:[%s2278_s3 + $0xd8] sm:$0xff] %v1918_v57 }
  0xf6   :  { %v1074_v54 = vadd.f32 %v1073_v44, %v1860_v17  ;;  %v498_v10 = vpop.f32.mrf.mxu2 }
  0xf7   :  { %v421_v58 = vpop.f32.mrf.mxu0  ;;  %v461_v59 = vpop.f32.mrf.mxu1 }
  0xf8   :  { %v422_v61 = vadd.f32 %v1668_v36, %v421_v58  ;;  %v462_v62 = vadd.f32 %v1668_v36, %v461_v59  ;;  %v1144_v58 = vmul.f32 %v1860_v17, %v1860_v17  ;;  %v1206_v59 = vadd.f32 %v1205_v33, %v1143_v25 }
  0xf9   :  { %v499_v17 = vadd.f32 %v1668_v36, %v498_v10 }
  0xfa   :  { %v563_v12 = vmax.f32 %v422_v61, 0.0  ;;  %v1934_v13 = vmax.f32 %v462_v62, 0.0  ;;  %v1145_v61 = vmul.f32 %v1882_v38, %v1882_v38  ;;  %v1207_v21 = vadd.f32 %v1206_v59, %v1144_v58 }
  0xfb   :  { %v2015_v52 = vmax.f32 %v499_v17, 0.0 }
  0xfc   :  { %627 = vst [vmem:[%s2278_s3 + $0x60] sm:$0xff] %v563_v12  ;;  %v1208_v34 = vadd.f32 %v1207_v21, %v1145_v61  ;;  %v1147_v47 = vmul.f32 %v563_v12, %v563_v12  ;;  %v1151_v21 = vmul.f32 %v1672_v42, %v1672_v42 }
  0xfd   :  { %643 = vst [vmem:[%s2278_s3 + $0xe0] sm:$0xff] %v1934_v13 }
  0xfe   :  { %v1209_v53 = vadd.f32 %v1208_v34, %v1146_v24  ;;  %658 = vst [vmem:[%s2278_s3 + $0x158] sm:$0xff] %v2015_v52 }
  0xff   :  { %v423_v26 = vpop.f32.mrf.mxu0  ;;  %v463_v31 = vpop.f32.mrf.mxu1 }
 0x100   :  { %v424_v27 = vadd.f32 %v1668_v36, %v423_v26  ;;  %v464_v30 = vadd.f32 %v1668_v36, %v463_v31  ;;  %v529_v26 = vadd.f32 %v1668_v36, %v528_v11  ;;  %v1075_v31 = vadd.f32 %v1074_v54, %v1882_v38 }
 0x102   :  { %v564_v49 = vmax.f32 %v424_v27, 0.0  ;;  %v1978_v51 = vmax.f32 %v464_v30, 0.0  ;;  %v1076_v48 = vadd.f32 %v1075_v31, %v1916_v56  ;;  %v2021_v38 = vmax.f32 %v529_v26, 0.0 }
 0x103   :  { %v1210_v56 = vadd.f32 %v1209_v53, %v1147_v47  ;;  %v1152_v26 = vmul.f32 %v1691_v50, %v1691_v50 }
 0x104   :  { %628 = vst [vmem:[%s2278_s3 + $0x68] sm:$0xff] %v564_v49  ;;  %v1077_v25 = vadd.f32 %v1076_v48, %v563_v12  ;;  %v1148_v33 = vmul.f32 %v564_v49, %v564_v49 }
 0x105   :  { %644 = vst [vmem:[%s2278_s3 + $0xe8] sm:$0xff] %v1978_v51 }
 0x106   :  { %v1078_v59 = vadd.f32 %v1077_v25, %v564_v49  ;;  %670 = vst [vmem:[%s2278_s3 + $0x1b8] sm:$0xff] %v2021_v38  ;;  %v1153_v25 = vmul.f32 %v1702_v60, %v1702_v60 }
 0x107   :  { %v426_v62 = vpop.f32.mrf.mxu0  ;;  %v466_v1 = vpop.f32.mrf.mxu1 }
 0x108   :  { %v427_v2 = vadd.f32 %v1668_v36, %v426_v62  ;;  %v467_v5 = vadd.f32 %v1668_v36, %v466_v1  ;;  %v501_v62 = vpop.f32.mrf.mxu2  ;;  %v531_v1 = vpop.f32.mrf.mxu3 }
 0x109   :  { %v502_v34 = vadd.f32 %v1668_v36, %v501_v62  ;;  %v532_v47 = vadd.f32 %v1668_v36, %v531_v1 }
 0x10a   :  { %v565_v27 = vmax.f32 %v427_v2, 0.0  ;;  %v2005_v30 = vmax.f32 %v467_v5, 0.0  ;;  %v1211_v2 = vadd.f32 %v1210_v56, %v1148_v33 }
 0x10c   :  { %629 = vst [vmem:[%s2278_s3 + $0x70] sm:$0xff] %v565_v27  ;;  %v1149_v54 = vmul.f32 %v565_v27, %v565_v27  ;;  %v1079_v5 = vadd.f32 %v1078_v59, %v565_v27 }
 0x10d   :  { %645 = vst [vmem:[%s2278_s3 + $0xf0] sm:$0xff] %v2005_v30 }
 0x10e   :  { %v1212_v4 = vadd.f32 %v1211_v2, %v1149_v54 }
 0x10f   :  { %v428_v44 = vpop.f32.mrf.mxu0  ;;  %v468_v58 = vpop.f32.mrf.mxu1 }
 0x110   :  { %v429_v61 = vadd.f32 %v1668_v36, %v428_v44  ;;  %v469_v12 = vadd.f32 %v1668_v36, %v468_v58  ;;  %v503_v48 = vpop.f32.mrf.mxu2  ;;  %v533_v53 = vpop.f32.mrf.mxu3  ;;  %v2063_v58 = vmax.f32 %v502_v34, 0.0  ;;  %v1160_v34 = vmul.f32 %v1862_v18, %v1862_v18 }
 0x111   :  { %v504_v33 = vadd.f32 %v1668_v36, %v503_v48 }
 0x112   :  { %v566_v49 = vmax.f32 %v429_v61, 0.0  ;;  %v2041_v3 = vmax.f32 %v469_v12, 0.0  ;;  %v1154_v61 = vmul.f32 %v1717_v7, %v1717_v7  ;;  %659 = vst [vmem:[%s2278_s3 + $0x160] sm:$0xff] %v2063_v58 }
 0x113   :  { %v2067_v59 = vmax.f32 %v504_v33, 0.0 }
 0x114   :  { %630 = vst [vmem:[%s2278_s3 + $0x78] sm:$0xff] %v566_v49  ;;  %v1080_v10 = vadd.f32 %v1079_v5, %v566_v49  ;;  %v1150_v11 = vmul.f32 %v566_v49, %v566_v49 }
 0x115   :  { %646 = vst [vmem:[%s2278_s3 + $0xf8] sm:$0xff] %v2041_v3 }
 0x116   :  { %v1081_v24 = vadd.f32 %v1080_v10, %v1672_v42  ;;  %v1213_v17 = vadd.f32 %v1212_v4, %v1150_v11  ;;  %v534_v42 = vadd.f32 %v1668_v36, %v533_v53  ;;  %660 = vst [vmem:[%s2278_s3 + $0x168] sm:$0xff] %v2067_v59 }
 0x118   :  { %v1082_v31 = vadd.f32 %v1081_v24, %v1691_v50  ;;  %v1214_v27 = vadd.f32 %v1213_v17, %v1151_v21  ;;  %v2065_v50 = vmax.f32 %v532_v47, 0.0  ;;  %v2069_v54 = vmax.f32 %v534_v42, 0.0  ;;  %v506_v4 = vpop.f32.mrf.mxu2  ;;  %v536_v10 = vpop.f32.mrf.mxu3 }
 0x119   :  { %v1158_v24 = vmul.f32 %v1806_v55, %v1806_v55  ;;  %v537_v53 = vadd.f32 %v1668_v36, %v536_v10 }
 0x11a   :  { %v1083_v56 = vadd.f32 %v1082_v31, %v1702_v60  ;;  %v1215_v44 = vadd.f32 %v1214_v27, %v1152_v26  ;;  %671 = vst [vmem:[%s2278_s3 + $0x1c0] sm:$0xff] %v2065_v50  ;;  %v1155_v60 = vmul.f32 %v1732_v20, %v1732_v20  ;;  %v1159_v31 = vmul.f32 %v1828_v6, %v1828_v6 }
 0x11b   :  { %672 = vst [vmem:[%s2278_s3 + $0x1c8] sm:$0xff] %v2069_v54 }
 0x11c   :  { %v1084_v12 = vadd.f32 %v1083_v56, %v1717_v7  ;;  %v1216_v62 = vadd.f32 %v1215_v44, %v1153_v25  ;;  %v1156_v7 = vmul.f32 %v1761_v32, %v1761_v32 }
 0x11e   :  { %v1085_v1 = vadd.f32 %v1084_v12, %v1732_v20  ;;  %v1217_v2 = vadd.f32 %v1216_v62, %v1154_v61  ;;  %v1157_v20 = vmul.f32 %v1782_v45, %v1782_v45 }
 0x120   :  { %v1086_v5 = vadd.f32 %v1085_v1, %v1761_v32  ;;  %v1218_v49 = vadd.f32 %v1217_v2, %v1155_v60  ;;  %v508_v25 = vpop.f32.mrf.mxu2  ;;  %v538_v33 = vpop.f32.mrf.mxu3  ;;  %v1162_v60 = vmul.f32 %v1918_v57, %v1918_v57 }
 0x121   :  { %v509_v42 = vadd.f32 %v1668_v36, %v508_v25 }
 0x122   :  { %v1219_v11 = vadd.f32 %v1218_v49, %v1156_v7  ;;  %v1087_v21 = vadd.f32 %v1086_v5, %v1782_v45  ;;  %v507_v45 = vadd.f32 %v1668_v36, %v506_v4  ;;  %v1163_v7 = vmul.f32 %v1934_v13, %v1934_v13 }
 0x123   :  { %v2119_v12 = vmax.f32 %v509_v42, 0.0  ;;  %v1164_v4 = vmul.f32 %v1978_v51, %v1978_v51 }
 0x124   :  { %v1088_v17 = vadd.f32 %v1087_v21, %v1806_v55  ;;  %v1220_v26 = vadd.f32 %v1219_v11, %v1157_v20  ;;  %v1161_v55 = vmul.f32 %v1884_v39, %v1884_v39  ;;  %v2115_v61 = vmax.f32 %v507_v45, 0.0 }
 0x125   :  { %662 = vst [vmem:[%s2278_s3 + $0x178] sm:$0xff] %v2119_v12  ;;  %v1165_v11 = vmul.f32 %v2005_v30, %v2005_v30 }
 0x126   :  { %v1089_v32 = vadd.f32 %v1088_v17, %v1828_v6  ;;  %v1221_v27 = vadd.f32 %v1220_v26, %v1158_v24  ;;  %v539_v6 = vadd.f32 %v1668_v36, %v538_v33  ;;  %661 = vst [vmem:[%s2278_s3 + $0x170] sm:$0xff] %v2115_v61  ;;  %v1166_v17 = vmul.f32 %v2041_v3, %v2041_v3 }
 0x127   :  { %v1167_v26 = vmul.f32 %v1729_v16, %v1729_v16  ;;  %v1170_v33 = vmul.f32 %v1788_v46, %v1788_v46 }
 0x128   :  { %v1090_v47 = vadd.f32 %v1089_v32, %v1862_v18  ;;  %v1222_v48 = vadd.f32 %v1221_v27, %v1159_v31  ;;  %v2117_v18 = vmax.f32 %v537_v53, 0.0  ;;  %v2121_v62 = vmax.f32 %v539_v6, 0.0  ;;  %v541_v10 = vpop.f32.mrf.mxu3 }
 0x12a   :  { %v1091_v56 = vadd.f32 %v1090_v47, %v1884_v39  ;;  %v1223_v44 = vadd.f32 %v1222_v48, %v1160_v34  ;;  %673 = vst [vmem:[%s2278_s3 + $0x1d0] sm:$0xff] %v2117_v18 }
 0x12b   :  { %674 = vst [vmem:[%s2278_s3 + $0x1d8] sm:$0xff] %v2121_v62 }
 0x12c   :  { %v1092_v1 = vadd.f32 %v1091_v56, %v1918_v57  ;;  %v1224_v2 = vadd.f32 %v1223_v44, %v1161_v55 }
 0x12e   :  { %v1093_v39 = vadd.f32 %v1092_v1, %v1934_v13  ;;  %v1225_v5 = vadd.f32 %v1224_v2, %v1162_v60  ;;  %v1173_v1 = vmul.f32 %v1876_v28, %v1876_v28 }
 0x130   :  { %v1226_v57 = vadd.f32 %v1225_v5, %v1163_v7  ;;  %v1094_v49 = vadd.f32 %v1093_v39, %v1978_v51  ;;  %v1168_v51 = vmul.f32 %v1741_v22, %v1741_v22  ;;  %v543_v47 = vpop.f32.mrf.mxu3  ;;  %v1174_v7 = vmul.f32 %v1894_v41, %v1894_v41 }
 0x131   :  { %v544_v48 = vadd.f32 %v1668_v36, %v543_v47  ;;  %v1181_v47 = vmul.f32 %v2115_v61, %v2115_v61 }
 0x132   :  { %v1227_v20 = vadd.f32 %v1226_v57, %v1164_v4  ;;  %v1095_v13 = vadd.f32 %v1094_v49, %v2005_v30  ;;  %v542_v30 = vadd.f32 %v1668_v36, %v541_v10  ;;  %v1175_v57 = vmul.f32 %v1936_v14, %v1936_v14 }
 0x134   :  { %v1228_v21 = vadd.f32 %v1227_v20, %v1165_v11  ;;  %v1096_v24 = vadd.f32 %v1095_v13, %v2041_v3  ;;  %v1169_v3 = vmul.f32 %v1777_v40, %v1777_v40  ;;  %v2165_v25 = vmax.f32 %v542_v30, 0.0 }
 0x136   :  { %v1097_v31 = vadd.f32 %v1096_v24, %v1729_v16  ;;  %v1229_v32 = vadd.f32 %v1228_v21, %v1166_v17  ;;  %v2167_v16 = vmax.f32 %v544_v48, 0.0  ;;  %675 = vst [vmem:[%s2278_s3 + $0x1e0] sm:$0xff] %v2165_v25 }
 0x138   :  { %v1098_v27 = vadd.f32 %v1097_v31, %v1741_v22  ;;  %v1230_v34 = vadd.f32 %v1229_v32, %v1167_v26  ;;  %676 = vst [vmem:[%s2278_s3 + $0x1e8] sm:$0xff] %v2167_v16  ;;  %v546_v60 = vpop.f32.mrf.mxu3  ;;  %v1179_v32 = vmul.f32 %v2063_v58, %v2063_v58 }
 0x13a   :  { %v1099_v45 = vadd.f32 %v1098_v27, %v1777_v40  ;;  %v1231_v53 = vadd.f32 %v1230_v34, %v1168_v51  ;;  %v1171_v40 = vmul.f32 %v1820_v63, %v1820_v63 }
 0x13c   :  { %v1100_v22 = vadd.f32 %v1099_v45, %v1788_v46  ;;  %v1232_v55 = vadd.f32 %v1231_v53, %v1169_v3  ;;  %v1172_v46 = vmul.f32 %v1838_v8, %v1838_v8  ;;  %v1182_v45 = vmul.f32 %v2119_v12, %v2119_v12 }
 0x13e   :  { %v1101_v42 = vadd.f32 %v1100_v22, %v1820_v63  ;;  %v1233_v6 = vadd.f32 %v1232_v55, %v1170_v33 }
 0x140   :  { %v1234_v56 = vadd.f32 %v1233_v6, %v1171_v40  ;;  %v1102_v44 = vadd.f32 %v1101_v42, %v1838_v8  ;;  %v1176_v8 = vmul.f32 %v1943_v19, %v1943_v19  ;;  %v548_v13 = vpop.f32.mrf.mxu3 }
 0x141   :  { %v549_v11 = vadd.f32 %v1668_v36, %v548_v13 }
 0x142   :  { %v1103_v2 = vadd.f32 %v1102_v44, %v1876_v28  ;;  %v1235_v39 = vadd.f32 %v1234_v56, %v1172_v46  ;;  %v547_v28 = vadd.f32 %v1668_v36, %v546_v60 }
 0x144   :  { %v1104_v5 = vadd.f32 %v1103_v2, %v1894_v41  ;;  %v1236_v63 = vadd.f32 %v1235_v39, %v1173_v1  ;;  %v1177_v41 = vmul.f32 %v2007_v37, %v2007_v37  ;;  %v613_v17 = vmax.f32 %v547_v28, 0.0 }
 0x146   :  { %v1105_v49 = vadd.f32 %v1104_v5, %v1936_v14  ;;  %v1237_v4 = vadd.f32 %v1236_v63, %v1174_v7  ;;  %v2203_v14 = vmax.f32 %v549_v11, 0.0  ;;  %677 = vst [vmem:[%s2278_s3 + $0x1f0] sm:$0xff] %v613_v17  ;;  %v1195_v11 = vmul.f32 %v2165_v25, %v2165_v25 }
 0x148   :  { %v1106_v10 = vadd.f32 %v1105_v49, %v1943_v19  ;;  %v1238_v20 = vadd.f32 %v1237_v4, %v1175_v57  ;;  %v1178_v19 = vmul.f32 %v2015_v52, %v2015_v52  ;;  %678 = vst [vmem:[%s2278_s3 + $0x1f8] sm:$0xff] %v2203_v14 }
 0x14a   :  { %v1107_v21 = vadd.f32 %v1106_v10, %v2007_v37  ;;  %v1239_v24 = vadd.f32 %v1238_v20, %v1176_v8  ;;  %v1194_v20 = vmul.f32 %v2121_v62, %v2121_v62 }
 0x14c   :  { %v1108_v26 = vadd.f32 %v1107_v21, %v2015_v52  ;;  %v1240_v31 = vadd.f32 %v1239_v24, %v1177_v41  ;;  %v1180_v52 = vmul.f32 %v2067_v59, %v2067_v59  ;;  %v1196_v21 = vmul.f32 %v2167_v16, %v2167_v16 }
 0x14e   :  { %v1241_v36 = vadd.f32 %v1240_v31, %v1178_v19  ;;  %v1109_v37 = vadd.f32 %v1108_v26, %v2063_v58  ;;  %v1183_v58 = vmul.f32 %v1822_v0, %v1822_v0  ;;  %v1197_v26 = vmul.f32 %v613_v17, %v613_v17 }
 0x150   :  { %v1242_v51 = vadd.f32 %v1241_v36, %v1179_v32  ;;  %v1110_v27 = vadd.f32 %v1109_v37, %v2067_v59  ;;  %v1184_v59 = vmul.f32 %v1840_v9, %v1840_v9 }
 0x152   :  { %v1243_v34 = vadd.f32 %v1242_v51, %v1180_v52  ;;  %v1111_v30 = vadd.f32 %v1110_v27, %v2115_v61  ;;  %v1185_v61 = vmul.f32 %v1878_v29, %v1878_v29 }
 0x154   :  { %v1244_v48 = vadd.f32 %v1243_v34, %v1181_v47  ;;  %v1112_v3 = vadd.f32 %v1111_v30, %v2119_v12  ;;  %v1186_v12 = vmul.f32 %v1896_v43, %v1896_v43 }
 0x156   :  { %v1113_v53 = vadd.f32 %v1112_v3, %v1822_v0  ;;  %v1245_v33 = vadd.f32 %v1244_v48, %v1182_v45  ;;  %v1187_v0 = vmul.f32 %v1938_v15, %v1938_v15 }
 0x158   :  { %v1114_v22 = vadd.f32 %v1113_v53, %v1840_v9  ;;  %v1246_v55 = vadd.f32 %v1245_v33, %v1183_v58  ;;  %v1188_v9 = vmul.f32 %v1951_v23, %v1951_v23 }
 0x15a   :  { %v1115_v40 = vadd.f32 %v1114_v22, %v1878_v29  ;;  %v1247_v42 = vadd.f32 %v1246_v55, %v1184_v59  ;;  %v1189_v29 = vmul.f32 %v2009_v35, %v2009_v35 }
 0x15c   :  { %v1116_v6 = vadd.f32 %v1115_v40, %v1896_v43  ;;  %v1248_v46 = vadd.f32 %v1247_v42, %v1185_v61  ;;  %v1190_v43 = vmul.f32 %v2021_v38, %v2021_v38 }
 0x15e   :  { %v1117_v56 = vadd.f32 %v1116_v6, %v1938_v15  ;;  %v1249_v44 = vadd.f32 %v1248_v46, %v1186_v12  ;;  %v1191_v15 = vmul.f32 %v2065_v50, %v2065_v50 }
 0x160   :  { %v1250_v60 = vadd.f32 %v1249_v44, %v1187_v0  ;;  %v1118_v1 = vadd.f32 %v1117_v56, %v1951_v23  ;;  %v1192_v23 = vmul.f32 %v2069_v54, %v2069_v54 }
 0x162   :  { %v1119_v2 = vadd.f32 %v1118_v1, %v2009_v35  ;;  %v1251_v39 = vadd.f32 %v1250_v60, %v1188_v9  ;;  %v1193_v35 = vmul.f32 %v2117_v18, %v2117_v18 }
 0x164   :  { %v1120_v7 = vadd.f32 %v1119_v2, %v2021_v38  ;;  %v1252_v5 = vadd.f32 %v1251_v39, %v1189_v29 }
 0x166   :  { %v1121_v63 = vadd.f32 %v1120_v7, %v2065_v50  ;;  %v1253_v57 = vadd.f32 %v1252_v5, %v1190_v43 }
 0x168   :  { %v1122_v49 = vadd.f32 %v1121_v63, %v2069_v54  ;;  %v1254_v4 = vadd.f32 %v1253_v57, %v1191_v15 }
 0x16a   :  { %v1123_v8 = vadd.f32 %v1122_v49, %v2117_v18  ;;  %v1255_v10 = vadd.f32 %v1254_v4, %v1192_v23 }
 0x16c   :  { %v1124_v38 = vadd.f32 %v1123_v8, %v2121_v62  ;;  %v1256_v28 = vadd.f32 %v1255_v10, %v1193_v35  ;;  %v1198_v62 = vmul.f32 %v2203_v14, %v2203_v14 }
 0x16e   :  { %v1257_v50 = vadd.f32 %v1256_v28, %v1194_v20  ;;  %v1125_v13 = vadd.f32 %v1124_v38, %v2165_v25  ;;  %v680_v25 = vlaneseq }
 0x170   :  { %v1258_v54 = vadd.f32 %v1257_v50, %v1195_v11  ;;  %v1126_v41 = vadd.f32 %v1125_v13, %v2167_v16  ;;  %v681_v47 = vshrl.u32 %v680_v25, 7 }
 0x172   :  { %v1259_v18 = vadd.f32 %v1258_v54, %v1196_v21  ;;  %v1127_v24 = vadd.f32 %v1126_v41, %v613_v17  ;;  %vm1269_vm2 = vcmp.eq.s32.totalorder %v681_v47, 1  ;;  %vm1268_vm3 = vcmp.eq.s32.totalorder %v681_v47, 0 }
 0x174   :  { %v1260_v19 = vadd.f32 %v1259_v18, %v1197_v26  ;;  %v1128_v31 = vadd.f32 %v1127_v24, %v2203_v14 }
 0x176   :  { %v1129_v36 = vrot.slane %v1128_v31, 4  ;;  %v1261_v37 = vadd.f32 %v1260_v19, %v1198_v62 }
 0x178   :  { %v1130_v32 = vadd.f32 %v1129_v36, %v1128_v31  ;;  %v1262_v51 = vrot.slane %v1261_v37, 4 }
 0x17a   :  { %v1131_v27 = vrot.slane %v1130_v32, 2  ;;  %v1263_v52 = vadd.f32 %v1262_v51, %v1261_v37 }
 0x17c   :  { %v1132_v34 = vadd.f32 %v1131_v27, %v1130_v32  ;;  %v1264_v30 = vrot.slane %v1263_v52, 2 }
 0x17e   :  { %v1265_v16 = vadd.f32 %v1264_v30, %v1263_v52  ;;  %v1133_v48 = vrot.slane %v1132_v34, 1 }
 0x180   :  { %v1266_v3 = vrot.slane %v1265_v16, 1  ;;  %v1134_v45 = vadd.f32 %v1133_v48, %v1132_v34 }
 0x182   :  { %v1267_v17 = vadd.f32 %v1266_v3, %v1265_v16 }
 0x184   :  { %v1272_v58 = vsel %vm1269_vm2, %v1267_v17, 0.0 }
 0x185   :  { %v1275_v53 = vsel %vm1268_vm3, %v1134_v45, %v1272_v58 }
 0x186   :  { %1276 = vst [vmem:[%s2279_s4] sm:$0xff] %v1275_v53 }

</bundles_post_ra>
